<compile_context>
chip_gen: v7x
topology: tpu7x:2x2x1
jax: 0.10.0
libtpu: 0.0.40
codegen_flags: <defaults>
</compile_context>

<pallas_src>
import numpy as np
import jax
import jax.numpy as jnp
from jax.experimental import pallas as pl
from jax.experimental.pallas import tpu as pltpu


# ----------------------------------------------------------------------------
# Kernel: one (tile, W) block of the RoPE table per grid step.
#   ids_ref : (tile, K)        positions per axis (K = n_axes padded to 8 with zeros)
#   om_ref  : (K, d_half)      omega_i,f (zero outside axis i's frequency range)
#   pc_ref  : (d_half, W)      0/1 scatter: cos_f -> lanes 4f and 4f+3
#   ps_ref  : (d_half, W)      0/±1 scatter: sin_f -> lanes 4f+2 (+1) and 4f+1 (-1)
# ----------------------------------------------------------------------------
def _embed_nd_kernel(ids_ref, om_ref, pc_ref, ps_ref, out_ref):
    # Angles for every frequency of every axis: compact (tile, d_half) slab on the MXU.
    ang = jnp.dot(ids_ref[...], om_ref[...], preferred_element_type=jnp.float32)
    # Exact cos/sin, once per frequency (no phase-fold approximation).
    c = jnp.cos(ang)
    s = jnp.sin(ang)
    # Expand to the interleaved [cos, -sin, sin, cos] lane order with two scatter
    # matmuls on the idle MXU; keeps the store one lane-dense unmasked (tile, W) write.
    out = (jnp.dot(c, pc_ref[...], preferred_element_type=jnp.float32)
           + jnp.dot(s, ps_ref[...], preferred_element_type=jnp.float32))
    out_ref[...] = out.astype(out_ref.dtype)


def _round_up8(x):
    return ((x + 7) // 8) * 8


def _pick_tile(n, *, max_tile=2048, min_blocks=4):
    """Row tile: multiple of 8, aiming for >= min_blocks grid steps (v7x has 2 TCs),
    capped at max_tile. Ragged last block is handled by Pallas (no pad / no slice)."""
    tile = _round_up8(-(-n // min_blocks))
    tile = min(tile, max_tile, _round_up8(n))
    return max(tile, 8)


def _build_tables(axes_dim, theta):
    """Trace-time constant tables: omegas per axis + the two 0/±1 scatter matrices."""
    n_axes = len(axes_dim)
    d_half = sum(axes_dim) // 2
    W = 4 * d_half
    K = _round_up8(n_axes)                                  # contraction dim, zero-padded

    om = np.zeros((K, d_half), dtype=np.float32)
    f0 = 0
    for i, d in enumerate(axes_dim):
        scale = np.arange(0, d, 2, dtype=np.float64) / d    # float64 like torch, then cast
        om[i, f0:f0 + d // 2] = (1.0 / theta ** scale).astype(np.float32)
        f0 += d // 2

    f = np.arange(d_half)
    pc = np.zeros((d_half, W), dtype=np.float32)
    ps = np.zeros((d_half, W), dtype=np.float32)
    pc[f, 4 * f + 0] = 1.0                                  # cos
    pc[f, 4 * f + 3] = 1.0                                  # cos
    ps[f, 4 * f + 1] = -1.0                                 # -sin
    ps[f, 4 * f + 2] = 1.0                                  # sin
    return jnp.asarray(om), jnp.asarray(pc), jnp.asarray(ps)


def embed_nd(ids, axes_dim, theta, *, max_tile=2048, min_blocks=4,
             out_dtype=jnp.float32):
    """Pallas implementation of EmbedND.forward.

    ids: (B, S, n_axes) float array of positions
    returns: (B, 1, S, sum(axes_dim)//2, 2, 2) in out_dtype (float32 by default)
    """
    B, S, n_axes = ids.shape
    assert n_axes == len(axes_dim)
    assert all(d % 2 == 0 for d in axes_dim)
    d_half = sum(axes_dim) // 2
    W = d_half * 4

    om, pc, ps = _build_tables(axes_dim, theta)
    K = om.shape[0]

    N = B * S
    tile = _pick_tile(N, max_tile=max_tile, min_blocks=min_blocks)
    num_blocks = -(-N // tile)                              # ragged grid; no pad/slice

    ids_flat = ids.reshape(N, n_axes).astype(jnp.float32)
    ids_aug = jnp.pad(ids_flat, ((0, 0), (0, K - n_axes)))  # explicit zero K-padding

    out_flat = pl.pallas_call(
        _embed_nd_kernel,
        out_shape=jax.ShapeDtypeStruct((N, W), out_dtype),
        grid_spec=pltpu.PrefetchScalarGridSpec(
            num_scalar_prefetch=0,
            grid=(num_blocks,),
            in_specs=[
                pl.BlockSpec((tile, K), lambda i: (i, 0)),        # ids rows
                pl.BlockSpec((K, d_half), lambda i: (0, 0)),      # omega table (constant)
                pl.BlockSpec((d_half, W), lambda i: (0, 0)),      # cos scatter (constant)
                pl.BlockSpec((d_half, W), lambda i: (0, 0)),      # sin scatter (constant)
            ],
            out_specs=pl.BlockSpec((tile, W), lambda i: (i, 0)),  # lane-dense output
        ),
        compiler_params=pltpu.CompilerParams(
            dimension_semantics=("parallel",)),             # shards blocks across v7x TCs
    )(ids_aug, om, pc, ps)

    out = out_flat.reshape(B, S, d_half, 2, 2)
    return out[:, None]                                     # unsqueeze(1)


# ----------------------------------------------------------------------------
# Pure-JAX reference (mirrors the torch code) for correctness checking.
# ----------------------------------------------------------------------------
def _rope_ref(pos, dim, theta):
    scale = np.arange(0, dim, 2, dtype=np.float64) / dim
    omega = jnp.asarray((1.0 / theta ** scale).astype(np.float32))
    out = pos[..., None] * omega                            # (B, S, dim//2)
    cos_out, sin_out = jnp.cos(out), jnp.sin(out)
    stacked = jnp.stack([cos_out, -sin_out, sin_out, cos_out], axis=-1)
    return stacked.reshape(pos.shape[0], pos.shape[1], dim // 2, 2, 2).astype(jnp.float32)


def _embed_nd_ref(ids, axes_dim, theta):
    n_axes = ids.shape[-1]
    emb = jnp.concatenate(
        [_rope_ref(ids[..., i], axes_dim[i], theta) for i in range(n_axes)],
        axis=-3)
    return emb[:, None]


def _prepare_latent_image_ids(batch_size, height, width):
    h2, w2 = height // 2, width // 2
    ids = np.zeros((h2, w2, 3), dtype=np.float32)
    ids[..., 1] += np.arange(h2, dtype=np.float32)[:, None]
    ids[..., 2] += np.arange(w2, dtype=np.float32)[None, :]
    ids = np.broadcast_to(ids[None], (batch_size, h2, w2, 3))
    return jnp.asarray(ids.reshape(batch_size, h2 * w2, 3))


if __name__ == "__main__":
    key = jax.random.PRNGKey(0)
    k_txt1, k_txt2 = jax.random.split(key)
    theta = 10000
    axes_dim = (16, 56, 56)        # FLUX head split (sum=128 -> 64 freqs -> W=256)
    d_half = sum(axes_dim) // 2

    # Case 1: batch=1, 8 text tokens + 32x32 latent (16x16 = 256 image tokens) -> N=264.
    #   tile=72, grid=4, ragged last block (48 of 72 rows valid).
    img_ids = _prepare_latent_image_ids(1, 32, 32)                        # (1, 256, 3)
    text_ids = jnp.floor(jax.random.uniform(k_txt1, (1, 8, 3)) * 16.0)    # (1, 8, 3)
    ids = jnp.concatenate([text_ids, img_ids], axis=1)                    # (1, 264, 3)

    ref = _embed_nd_ref(ids, axes_dim, theta)
    out = jax.block_until_ready(embed_nd(ids, axes_dim, theta))
    assert out.shape == ref.shape == (1, 1, 264, d_half, 2, 2), out.shape
    np.testing.assert_allclose(np.asarray(out), np.asarray(ref), rtol=2e-5, atol=2e-5)

    # Case 2: batch=2, 8 text tokens + 16x16 latent (64 image tokens) -> N=144.
    #   tile=40, grid=4, ragged last block (24 of 40 rows valid); exercises B>1 reshape.
    img_ids2 = _prepare_latent_image_ids(2, 16, 16)                       # (2, 64, 3)
    text_ids2 = jnp.floor(jax.random.uniform(k_txt2, (2, 8, 3)) * 8.0)    # (2, 8, 3)
    ids2 = jnp.concatenate([text_ids2, img_ids2], axis=1)                 # (2, 72, 3)

    ref2 = _embed_nd_ref(ids2, axes_dim, theta)
    out2 = jax.block_until_ready(embed_nd(ids2, axes_dim, theta))
    assert out2.shape == ref2.shape == (2, 1, 72, d_half, 2, 2), out2.shape
    np.testing.assert_allclose(np.asarray(out2), np.asarray(ref2), rtol=2e-5, atol=2e-5)

    print("KERNEL_OK")
</pallas_src>

<mosaic_0001>
module attributes {stable_mosaic.version = 11 : i64} {
  func.func @_embed_nd_kernel(%arg0: i32, %arg1: memref<72x8xf32, #tpu.memory_space<vmem>>, %arg2: memref<8x64xf32, #tpu.memory_space<vmem>>, %arg3: memref<64x256xf32, #tpu.memory_space<vmem>>, %arg4: memref<64x256xf32, #tpu.memory_space<vmem>>, %arg5: memref<72x256xf32, #tpu.memory_space<vmem>>) attributes {dimension_semantics = [#tpu.dimension_semantics<parallel>], iteration_bounds = array<i64: 4>, scalar_prefetch = 0 : i64, scratch_operands = 0 : i64, tpu.core_type = #tpu.core_type<tc>, window_params = [{transform_indices = @transform_0, window_bounds = array<i64: 72, 8>}, {pipeline_mode = #tpu.pipeline_mode<synchronous>, transform_indices = @transform_1, window_bounds = array<i64: 8, 64>}, {pipeline_mode = #tpu.pipeline_mode<synchronous>, transform_indices = @transform_2, window_bounds = array<i64: 64, 256>}, {pipeline_mode = #tpu.pipeline_mode<synchronous>, transform_indices = @transform_3, window_bounds = array<i64: 64, 256>}, {transform_indices = @transform_4, window_bounds = array<i64: 72, 256>}]} {
    %c0 = arith.constant 0 : index
    %c0_0 = arith.constant 0 : index
    %0 = vector.load %arg1[%c0, %c0_0] : memref<72x8xf32, #tpu.memory_space<vmem>>, vector<72x8xf32>
    %c0_1 = arith.constant 0 : index
    %c0_2 = arith.constant 0 : index
    %1 = vector.load %arg2[%c0_1, %c0_2] : memref<8x64xf32, #tpu.memory_space<vmem>>, vector<8x64xf32>
    %cst = arith.constant dense<0.000000e+00> : vector<72x64xf32>
    %2 = tpu.matmul %0, %1, %cst {dimension_numbers = #tpu.dot_dimension_numbers<[1], [0], [0], [1], [0, 0, 1, 1], [], []>} : vector<72x8xf32>, vector<8x64xf32>, vector<72x64xf32> -> vector<72x64xf32>
    %3 = math.cos %2 : vector<72x64xf32>
    %4 = math.sin %2 : vector<72x64xf32>
    %c0_3 = arith.constant 0 : index
    %c0_4 = arith.constant 0 : index
    %5 = vector.load %arg3[%c0_3, %c0_4] : memref<64x256xf32, #tpu.memory_space<vmem>>, vector<64x256xf32>
    %cst_5 = arith.constant dense<0.000000e+00> : vector<72x256xf32>
    %6 = tpu.matmul %3, %5, %cst_5 {dimension_numbers = #tpu.dot_dimension_numbers<[1], [0], [0], [1], [0, 0, 1, 1], [], []>} : vector<72x64xf32>, vector<64x256xf32>, vector<72x256xf32> -> vector<72x256xf32>
    %c0_6 = arith.constant 0 : index
    %c0_7 = arith.constant 0 : index
    %7 = vector.load %arg4[%c0_6, %c0_7] : memref<64x256xf32, #tpu.memory_space<vmem>>, vector<64x256xf32>
    %cst_8 = arith.constant dense<0.000000e+00> : vector<72x256xf32>
    %8 = tpu.matmul %4, %7, %cst_8 {dimension_numbers = #tpu.dot_dimension_numbers<[1], [0], [0], [1], [0, 0, 1, 1], [], []>} : vector<72x64xf32>, vector<64x256xf32>, vector<72x256xf32> -> vector<72x256xf32>
    %9 = arith.addf %6, %8 : vector<72x256xf32>
    %c0_9 = arith.constant 0 : index
    %c0_10 = arith.constant 0 : index
    %10 = vector.load %arg5[%c0_9, %c0_10] : memref<72x256xf32, #tpu.memory_space<vmem>>, vector<72x256xf32>
    tpu.vector_store %arg5[%c0_9, %c0_10], %9 {strides = array<i32>} : memref<72x256xf32, #tpu.memory_space<vmem>>, vector<72x256xf32>,
    return
  }
  func.func @transform_0(%arg0: i32) -> (i32, i32) {
    %c0_i32 = arith.constant 0 : i32
    %c0_i32_0 = arith.constant 0 : i32
    return %arg0, %c0_i32 : i32, i32
  }
  func.func @transform_1(%arg0: i32) -> (i32, i32) {
    %c0_i32 = arith.constant 0 : i32
    %c0_i32_0 = arith.constant 0 : i32
    %c0_i32_1 = arith.constant 0 : i32
    return %c0_i32, %c0_i32_0 : i32, i32
  }
  func.func @transform_2(%arg0: i32) -> (i32, i32) {
    %c0_i32 = arith.constant 0 : i32
    %c0_i32_0 = arith.constant 0 : i32
    %c0_i32_1 = arith.constant 0 : i32
    return %c0_i32, %c0_i32_0 : i32, i32
  }
  func.func @transform_3(%arg0: i32) -> (i32, i32) {
    %c0_i32 = arith.constant 0 : i32
    %c0_i32_0 = arith.constant 0 : i32
    %c0_i32_1 = arith.constant 0 : i32
    return %c0_i32, %c0_i32_0 : i32, i32
  }
  func.func @transform_4(%arg0: i32) -> (i32, i32) {
    %c0_i32 = arith.constant 0 : i32
    %c0_i32_0 = arith.constant 0 : i32
    return %arg0, %c0_i32 : i32, i32
  }
}

</mosaic_0001>

<bundles_post_ra>
// kernel: tpu_custom_call.1
= control target key start
LH: loop header
LB: loop body
LE: loop exit
PB: predicated region body
PF: predicated region fallthrough
CT: control target
= control target key end

     0   :  { %9 = vsyncpa [#allocation3], 0  ;;  %s4271_s0 = inlined_call_operand.vmem [shape: f32[264,8], index: 0, kind: input, shape index: {}]   ;;  %s4272_s1 = inlined_call_operand.vmem [shape: f32[8,64], index: 1, kind: input, shape index: {}]   ;;  %s4273_s2 = inlined_call_operand.vmem [shape: f32[64,256], index: 2, kind: input, shape index: {}]   ;;  %s4274_s3 = inlined_call_operand.vmem [shape: f32[64,256], index: 3, kind: input, shape index: {}]   ;;  %s4275_s4 = inlined_call_operand.hbm [shape: f32[264,256], index: 4, kind: output, shape index: {}]  }
   0x1   :  { %11 = vsyncpa [#allocation3 + $0x1], 0  ;;  %s3097_s15 = smov 0   ;;  %s3099_s16 = smov 0  }
   0x2   :  { %s3101_s17 = smov 0   ;;  %s3103_s18 = smov 0  }
   0x3 LB: > { %s3118_s19 = sadd.s32 4294967295, %s3059_s18   ;;  %s2662_s20 = sadd.s32 4294967294, %s3059_s18   ;;  %s3059_s18 = sphi %s3103_s18, %s4328_s18   ;;  %s3055_s17 = sphi %s3101_s17, %s4327_s17   ;;  %s3051_s16 = sphi %s3099_s16, %s4326_s16   ;;  %s3047_s15 = sphi %s3097_s15, %s4325_s15  }
   0x4   : > { %s3122_s21 = sadd.s32 1, %s3059_s18   ;;  %s113_s22 = sadd.s32 1, %s3055_s17 }
   0x5   : > { %s110_s23 = ssub.s32 %s3059_s18, %s3122_s21  ;;  %p123_p0 = scmp.ne.s32.totalorder %s3055_s17, %s3051_s16 }
   0x6   : > { %p111_p1 = scmp.eq.s32.totalorder %s110_s23, 0  ;;  %p124_p2 = scmp.eq.s32.totalorder %s3118_s19, 3 }
   0x7   : > { %p129_p3 = scmp.ne.s32.totalorder %s3051_s16, %s3047_s15  ;;  %p130_p4 = scmp.eq.s32.totalorder %s2662_s20, 3 }
   0x8   : > { %s3133_s24 = scalar_select %p111_p1, %s3055_s17, %s113_s22  }
   0x9   : > { %p3135_p5 = por %p124_p2, %p123_p0  ;;  %p3139_p6 = por %p130_p4, %p129_p3 }
   0xa   : > { %p2665_p7 = scmp.ge.s32.totalorder %s3059_s18, 1  ;;  %p174_p8 = scmp.lt.s32.totalorder %s3059_s18, 5 }
   0xc   : > { %p175_p9 = pnand %p2665_p7, %p174_p8 }
   0xe   : > { %178 = sbr.rel (%p175_p9) target bundleno = 747 (0x2eb), region = 36 }
  0x15   : > { %v233_v0 = vld [vmem:[%s4272_s1] sm:$0xff]  ;;  %s3149_s29 = smul.u32 9, %s3118_s19  ;;  %v4276_v1 = vmov 0.0   ;;  %vm3062_vm0 = vmmov 0   ;;  %vm234_vm1 = vcmask 64512   ;;  %s201_s9 = sand.u32 1, %s3051_s16  }
  0x16   : > { %2789 = vmatprep.subr.mxu0 %v4276_v1  ;;  %2791 = vmatprep.mubr.msk.f32.mxu0 %vm3062_vm0, %v4276_v1  ;;  %v3063_v38 = vmov 683565275   ;;  %v4281_v40 = vmov 2475754826   ;;  %v4279_v44 = vmov 2131351028  }
  0x17   : > { %2790 = vmatpush3.msra.mxu0 %v233_v0  ;;  %p209_p10 = scmp.lt.s32.totalorder %s3149_s29, 32  ;;  %2359 = vmatprep.mubr.f32.mxu1 %v4276_v1  ;;  %v4283_v46 = vmov 2102212464   ;;  %v3067_v48 = vmov 920167782   ;;  %s2876_s10 = smul.u32 144, %s201_s9 }
  0x18   : > { %v4286_v55 = vmov 1326507024   ;;  %s4210_s12 = scalar_lea.sflag [#allocation3], %s201_s9  ;;  %s2587_s13 = ssub.s32 (%p3135_p5), 33, %s3149_s29 }
  0x19   : > { %s210_s30 = scalar_select %p209_p10, %s3149_s29, 32 }
  0x1a   : > { %s4188_s11 = scalar_lea.vmem [#allocation2], %s2876_s10  ;;  %p2588_p11 = scmp.lt.s32.totalorder (%p3135_p5), %s2587_s13, 9 }
  0x1b   : > { %s2666_s5 = sshll.u32 %s210_s30, 3 }
  0x1c   : > { %s212_s8 = scalar_lea.vmem %s4271_s0, %s2666_s5 }
  0x1d   : > { %v224_v2 = vld [vmem:[%s212_s8] sm:$0xff]  ;;  %v225_v3 = vld [vmem:[%s212_s8 + $0x8] sm:$0xff]  ;;  %v226_v4 = vld [vmem:[%s212_s8 + $0x10] sm:$0xff] }
  0x1e   : > { %2792 = vmatmul.mubr.msk.f32.vlgmr.msra.gmra.mrb[0].mxu0 %vm234_vm1, %v224_v2  ;;  %v227_v5 = vld [vmem:[%s212_s8 + $0x18] sm:$0xff]  ;;  %v228_v6 = vld [vmem:[%s212_s8 + $0x20] sm:$0xff]  ;;  %v229_v7 = vld [vmem:[%s212_s8 + $0x28] sm:$0xff] }
  0x1f   : > { %2794 = vmatprep.mubr.msk.f32.mxu0 %vm3062_vm0, %v4276_v1  ;;  %v230_v8 = vld [vmem:[%s212_s8 + $0x30] sm:$0xff]  ;;  %v231_v9 = vld [vmem:[%s212_s8 + $0x38] sm:$0xff]  ;;  %v232_v10 = vld [vmem:[%s212_s8 + $0x40] sm:$0xff] }
  0x22   : > { %2795 = vmatmul.mubr.msk.f32.gmra.mrb[2].mxu0 %vm234_vm1, %v225_v3 }
  0x23   : > { %2797 = vmatprep.mubr.msk.f32.mxu0 %vm3062_vm0, %v4276_v1 }
  0x26   : > { %2798 = vmatmul.mubr.msk.f32.gmra.mrb[4].mxu0 %vm234_vm1, %v226_v4 }
  0x27   : > { %2800 = vmatprep.mubr.msk.f32.mxu0 %vm3062_vm0, %v4276_v1 }
  0x2a   : > { %2801 = vmatmul.mubr.msk.f32.gmra.mrb[6].mxu0 %vm234_vm1, %v227_v5 }
  0x2b   : > { %2803 = vmatprep.mubr.msk.f32.mxu0 %vm3062_vm0, %v4276_v1 }
  0x2e   : > { %2804 = vmatmul.mubr.msk.f32.gmra.mrb[8].mxu0 %vm234_vm1, %v228_v6 }
  0x2f   : > { %2806 = vmatprep.mubr.msk.f32.mxu0 %vm3062_vm0, %v4276_v1 }
  0x32   : > { %2807 = vmatmul.mubr.msk.f32.gmra.mrb[10].mxu0 %vm234_vm1, %v229_v7 }
  0x33   : > { %2809 = vmatprep.mubr.msk.f32.mxu0 %vm3062_vm0, %v4276_v1 }
  0x36   : > { %2810 = vmatmul.mubr.msk.f32.gmra.mrb[12].mxu0 %vm234_vm1, %v230_v8 }
  0x37   : > { %2812 = vmatprep.mubr.msk.f32.mxu0 %vm3062_vm0, %v4276_v1 }
  0x3a   : > { %2813 = vmatmul.mubr.msk.f32.gmra.mrb[14].mxu0 %vm234_vm1, %v231_v9 }
  0x3b   : > { %2815 = vmatprep.mubr.msk.f32.mxu0 %vm3062_vm0, %v4276_v1 }
  0x3e   : > { %2816 = vmatmul.mubr.msk.f32.gmra.mrb[16].mxu0 %vm234_vm1, %v232_v10 }
  0x3f   : > { %2505 = vmatprep.mubr.f32.mxu0 %v4276_v1 }
  0xf1   : > { %v3186_v11 = vpop.f32.mrb[0].mxu0 }
  0xf2   : > { %v372_v12 = vand.u32 2147483647, %v3186_v11  ;;  %v375_v13 = vand.u32 2139095040, %v3186_v11  ;;  %v2793_v14 = vpop.f32.mrb[1].mxu0 }
  0xf4   : > { %v376_v15 = vshrl.u32 %v375_v13, 23  ;;  %v379_v16 = vand.u32 8388607, %v372_v12 }
  0xf5   : > { %v3192_v17 = vpop.f32.mrb[2].mxu0 }
  0xf6   : > { %v2676_v18 = vadd.s32 4294967169, %v376_v15  ;;  %v475_v19 = vand.u32 2147483647, %v3192_v17  ;;  %v2796_v20 = vpop.f32.mrb[3].mxu0  ;;  %v478_v21 = vand.u32 2139095040, %v3192_v17  ;;  %v380_v23 = vor.u32 8388608, %v379_v16 }
  0xf8   : > { %v382_v22 = vadd.s32 1, %v2676_v18  ;;  %v479_v24 = vshrl.u32 %v478_v21, 23  ;;  %v3198_v25 = vand.u32 8388607, %v475_v19  ;;  %v3203_v33 = vshll.u32 %v380_v23, 8 }
  0xf9   : > { %v3200_v26 = vpop.f32.mrb[4].mxu0 }
  0xfa   : > { %vm383_vm2 = vcmp.gt.s32.totalorder %v382_v22, 0  ;;  %v2799_v27 = vpop.f32.mrb[5].mxu0  ;;  %v2680_v29 = vadd.s32 4294967169, %v479_v24  ;;  %v581_v30 = vand.u32 2139095040, %v3200_v26  ;;  %v483_v34 = vor.u32 8388608, %v3198_v25 }
  0xfb   : > { %v384_v28 = vsel %vm383_vm2, %v382_v22, 0  ;;  %v578_v22 = vand.u32 2147483647, %v3200_v26 }
  0xfc   : > { %v385_v31 = vshrl.u32 %v384_v28, 5  ;;  %v386_v32 = vand.u32 31, %v384_v28  ;;  %v485_v35 = vadd.s32 1, %v2680_v29  ;;  %v582_v42 = vshrl.u32 %v581_v30, 23 }
  0xfd   : > { %v3206_v36 = vpop.f32.mrb[6].mxu0  ;;  %v3245_v30 = vshll.u32 %v483_v34, 8 }
  0xfe   : > { %v387_v37 = vsub.s32 32, %v386_v32  ;;  %v389_v39 = vshll.u32 %v3063_v38, %v386_v32  ;;  %v392_v41 = vshll.u32 %v4281_v40, %v386_v32  ;;  %v2802_v43 = vpop.f32.mrb[7].mxu0  ;;  %v395_v45 = vshll.u32 %v4279_v44, %v386_v32 }
  0xff   : > { %v398_v47 = vshll.u32 %v4283_v46, %v386_v32  ;;  %v401_v49 = vshll.u32 %v3067_v48, %v386_v32  ;;  %vm404_vm3 = vcmp.lt.s32.totalorder %v385_v31, 1  ;;  %vm405_vm4 = vcmp.lt.s32.totalorder %v385_v31, 2 }
 0x100   : > { %v390_v50 = vshrl.u32 %v4281_v40, %v387_v37  ;;  %v393_v51 = vshrl.u32 %v4279_v44, %v387_v37  ;;  %v396_v52 = vshrl.u32 %v4283_v46, %v387_v37  ;;  %v388_v53 = vshrl.u32 %v3063_v38, %v387_v37 }
 0x101   : > { %v399_v54 = vshrl.u32 %v3067_v48, %v387_v37  ;;  %v402_v56 = vshrl.u32 %v4286_v55, %v387_v37  ;;  %vm406_vm5 = vcmp.lt.s32.totalorder %v385_v31, 3  ;;  %v3219_v57 = vpop.f32.mrb[8].mxu0  ;;  %vm486_vm6 = vcmp.gt.s32.totalorder %v485_v35, 0 }
 0x102   : > { %v391_v58 = vor.u32 %v390_v50, %v389_v39  ;;  %v394_v59 = vor.u32 %v393_v51, %v392_v41  ;;  %v397_v60 = vor.u32 %v396_v52, %v395_v45  ;;  %v2805_v61 = vpop.f32.mrb[9].mxu0  ;;  %vm407_vm7 = vcmp.lt.s32.totalorder %v385_v31, 4 }
 0x103   : > { %v400_v62 = vor.u32 %v399_v54, %v398_v47  ;;  %v403_v63 = vor.u32 %v402_v56, %v401_v49  ;;  %v487_v0 = vsel %vm486_vm6, %v485_v35, 0  ;;  %v2684_v32 = vadd.s32 4294967169, %v582_v42 }
 0x104   : > { %v408_v2 = vsel %vm404_vm3, %v388_v53, %v391_v58  ;;  %v409_v3 = vsel %vm407_vm7, %v397_v60, 2102212464  ;;  %v412_v4 = vsel %vm404_vm3, %v391_v58, %v394_v59  ;;  %v416_v5 = vsel %vm404_vm3, %v394_v59, %v397_v60 }
 0x105   : > { %v410_v6 = vsel %vm406_vm5, %v394_v59, %v409_v3  ;;  %v413_v7 = vsel %vm407_vm7, %v400_v62, 920167782  ;;  %v417_v8 = vsel %vm407_vm7, %v403_v63, 1326507024  ;;  %v3225_v9 = vshrl.u32 %v487_v0, 5  ;;  %v3227_v10 = vpop.f32.mrb[10].mxu0 }
 0x106   : > { %4292 = vst [vmem:[#allocation5_spill] sm:$0xff] %v3227_v10  ;;  %v411_v13 = vsel %vm405_vm4, %v408_v2, %v410_v6  ;;  %v414_v14 = vsel %vm406_vm5, %v397_v60, %v413_v7  ;;  %v418_v15 = vsel %vm406_vm5, %v400_v62, %v417_v8  ;;  %v489_v16 = vand.u32 31, %v487_v0  ;;  %v2808_v18 = vpop.f32.mrb[11].mxu0 }
 0x107   : > { %v415_v20 = vsel %vm405_vm4, %v412_v4, %v414_v14  ;;  %v419_v21 = vsel %vm405_vm4, %v416_v5, %v418_v15  ;;  %v427_v28 = vmul.u32 %v3203_v33, %v411_v13  ;;  %vm507_vm8 = vcmp.lt.s32.totalorder %v3225_v9, 1 }
 0x108   : > { %v3236_v23 = vmul.u32.u64.low %v3203_v33, %v419_v21  ;;  %v3237_v24 = vmul.u32.u64.high %v3203_v33, %v419_v21, %v3236_v23  ;;  %v3240_v25 = vmul.u32.u64.low %v3203_v33, %v415_v20  ;;  %v3241_v27 = vmul.u32.u64.high %v3203_v33, %v415_v20, %v3240_v25 }
 0x109   : > { %v490_v29 = vsub.s32 32, %v489_v16  ;;  %v3247_v35 = vpop.f32.mrb[12].mxu0  ;;  %v492_v31 = vshll.u32 %v3063_v38, %v489_v16  ;;  %v495_v37 = vshll.u32 %v4281_v40, %v489_v16  ;;  %v498_v39 = vshll.u32 %v4279_v44, %v489_v16 }
 0x10a   : > { %v2811_v41 = vpop.f32.mrb[13].mxu0  ;;  %v501_v34 = vshll.u32 %v4283_v46, %v489_v16  ;;  %vm429_vm9 = vc.u32 %v3237_v24, %v3240_v25  ;;  %v430_v42 = vadd.s32 1, %v3241_v27  ;;  %v504_v49 = vshll.u32 %v3067_v48, %v489_v16 }
 0x10b   : > { %v493_v43 = vshrl.u32 %v4281_v40, %v490_v29  ;;  %v496_v45 = vshrl.u32 %v4279_v44, %v490_v29  ;;  %v499_v33 = vshrl.u32 %v4283_v46, %v490_v29  ;;  %v502_v47 = vshrl.u32 %v3067_v48, %v490_v29 }
 0x10c   : > { %v505_v53 = vshrl.u32 %v4286_v55, %v490_v29  ;;  %v431_v56 = vsel %vm429_vm9, %v430_v42, %v3241_v27  ;;  %vm508_vm10 = vcmp.lt.s32.totalorder %v3225_v9, 2  ;;  %vm510_vm11 = vcmp.lt.s32.totalorder %v3225_v9, 4 }
 0x10d   : > { %v494_v50 = vor.u32 %v493_v43, %v492_v31  ;;  %v497_v51 = vor.u32 %v496_v45, %v495_v37  ;;  %v500_v52 = vor.u32 %v499_v33, %v498_v39  ;;  %v3263_v54 = vpop.f32.mrb[14].mxu0  ;;  %v503_v58 = vor.u32 %v502_v47, %v501_v34 }
 0x10e   : > { %v2814_v59 = vpop.f32.mrb[15].mxu0  ;;  %v432_v60 = vadd.s32 %v431_v56, %v427_v28  ;;  %v491_v61 = vshrl.u32 %v3063_v38, %v490_v29  ;;  %v506_v62 = vor.u32 %v505_v53, %v504_v49  ;;  %vm509_vm12 = vcmp.lt.s32.totalorder %v3225_v9, 3 }
 0x10f   : > { %v512_v63 = vsel %vm510_vm11, %v500_v52, 2102212464  ;;  %v515_v0 = vsel %vm507_vm8, %v494_v50, %v497_v51  ;;  %v516_v2 = vsel %vm510_vm11, %v503_v58, 920167782  ;;  %v519_v3 = vsel %vm507_vm8, %v497_v51, %v500_v52 }
 0x110   : > { %v433_v4 = vadd.s32 536870912, %v432_v60  ;;  %v511_v5 = vsel %vm507_vm8, %v491_v61, %v494_v50  ;;  %v517_v6 = vsel %vm509_vm12, %v500_v52, %v516_v2  ;;  %v520_v7 = vsel %vm510_vm11, %v506_v62, 1326507024 }
 0x111   : > { %v3276_v8 = vpop.f32.mrb[16].mxu0  ;;  %v513_v13 = vsel %vm509_vm12, %v497_v51, %v512_v63  ;;  %v518_v14 = vsel %vm508_vm10, %v515_v0, %v517_v6  ;;  %v521_v15 = vsel %vm509_vm12, %v503_v58, %v520_v7  ;;  %v588_v16 = vadd.s32 1, %v2684_v32 }
 0x112   : > { %v2817_v18 = vpop.f32.mrb[17].mxu0  ;;  %v3280_v20 = vshrl.u32 %v433_v4, 30  ;;  %v522_v21 = vsel %vm508_vm10, %v519_v3, %v521_v15  ;;  %v3285_v23 = vmul.u32.u64.low %v3245_v30, %v518_v14  ;;  %v3286_v27 = vmul.u32.u64.high %v3245_v30, %v518_v14, %v3285_v23 }
 0x113   : > { %v3290_v28 = vmul.u32.u64.low %v3245_v30, %v522_v21  ;;  %v3291_v29 = vmul.u32.u64.high %v3245_v30, %v522_v21, %v3290_v28  ;;  %vm589_vm13 = vcmp.gt.s32.totalorder %v588_v16, 0  ;;  %v514_v32 = vsel %vm508_vm10, %v511_v5, %v513_v13 }
 0x114   : > { %v435_v31 = vshll.u32 %v3280_v20, 30  ;;  %v585_v37 = vand.u32 8388607, %v578_v22  ;;  %v590_v39 = vsel %vm589_vm13, %v588_v16, 0  ;;  %v533_v45 = vadd.s32 1, %v3286_v27 }
 0x115   : > { %v592_v41 = vand.u32 31, %v590_v39  ;;  %v530_v33 = vmul.u32 %v3245_v30, %v514_v32  ;;  %vm532_vm14 = vc.u32 %v3291_v29, %v3285_v23  ;;  %v591_v50 = vshrl.u32 %v590_v39, 5 }
 0x116   : > { %v3298_v43 = vsub.s32 %v432_v60, %v435_v31  ;;  %v534_v9 = vsel %vm532_vm14, %v533_v45, %v3286_v27  ;;  %v586_v47 = vor.u32 8388608, %v585_v37  ;;  %v428_v63 = vadd.s32 %v3240_v25, %v3237_v24 }
 0x117   : > { %v593_v34 = vsub.s32 32, %v592_v41  ;;  %v535_v49 = vadd.s32 %v534_v9, %v530_v33  ;;  %v595_v51 = vshll.u32 %v3063_v38, %v592_v41  ;;  %v601_v30 = vshll.u32 %v4279_v44, %v592_v41 }
 0x118   : > { %v438_v42 = vsub.s32 0, %v3298_v43  ;;  %v598_v60 = vshll.u32 %v4281_v40, %v592_v41  ;;  %v604_v61 = vshll.u32 %v4283_v46, %v592_v41  ;;  %v607_v14 = vshll.u32 %v3067_v48, %v592_v41 }
 0x119   : > { %v596_v52 = vshrl.u32 %v4281_v40, %v593_v34  ;;  %v599_v56 = vshrl.u32 %v4279_v44, %v593_v34  ;;  %v602_v58 = vshrl.u32 %v4283_v46, %v593_v34  ;;  %v536_v59 = vadd.s32 536870912, %v535_v49 }
 0x11a   : > { %v2677_v53 = vmin.u32 %v438_v42, %v3298_v43  ;;  %v605_v62 = vshrl.u32 %v3067_v48, %v593_v34  ;;  %v608_v7 = vshrl.u32 %v4286_v55, %v593_v34  ;;  %v626_v15 = vshll.u32 %v586_v47, 8 }
 0x11b   : > { %v597_v2 = vor.u32 %v596_v52, %v595_v51  ;;  %v603_v3 = vor.u32 %v602_v58, %v601_v30  ;;  %v3317_v4 = vshrl.u32 %v536_v59, 30  ;;  %v600_v5 = vor.u32 %v599_v56, %v598_v60 }
 0x11c   : > { %v440_v0 = vclz %v2677_v53  ;;  %v606_v6 = vor.u32 %v605_v62, %v604_v61  ;;  %v684_v16 = vand.u32 2139095040, %v3206_v36  ;;  %v594_v21 = vshrl.u32 %v3063_v38, %v593_v34 }
 0x11d   : > { %v538_v18 = vshll.u32 %v3317_v4, 30  ;;  %vm610_vm15 = vcmp.lt.s32.totalorder %v591_v50, 1  ;;  %vm613_vm0 = vcmp.lt.s32.totalorder %v591_v50, 4  ;;  %v609_v24 = vor.u32 %v608_v7, %v607_v14 }
 0x11e   : > { %v2678_v13 = vadd.s32 4294967294, %v440_v0  ;;  %v615_v25 = vsel %vm613_vm0, %v603_v3, 2102212464  ;;  %v619_v27 = vsel %vm613_vm0, %v606_v6, 920167782  ;;  %vm611_vm2 = vcmp.lt.s32.totalorder %v591_v50, 2 }
 0x11f   : > { %v3326_v31 = vsub.s32 %v535_v49, %v538_v18  ;;  %v618_v32 = vsel %vm610_vm15, %v597_v2, %v600_v5  ;;  %vm612_vm3 = vcmp.lt.s32.totalorder %v591_v50, 3  ;;  %v614_v41 = vsel %vm610_vm15, %v594_v21, %v597_v2 }
 0x120   : > { %vm2679_vm1 = vcmp.lt.s32.totalorder %v2678_v13, 0  ;;  %v616_v33 = vsel %vm612_vm3, %v600_v5, %v615_v25  ;;  %v620_v34 = vsel %vm612_vm3, %v603_v3, %v619_v27  ;;  %v622_v42 = vsel %vm610_vm15, %v600_v5, %v603_v3 }
 0x121   : > { %v443_v28 = vsel %vm2679_vm1, 0, %v2678_v13  ;;  %v541_v45 = vsub.s32 0, %v3326_v31  ;;  %v621_v51 = vsel %vm611_vm2, %v618_v32, %v620_v34  ;;  %v623_v49 = vsel %vm613_vm0, %v609_v24, 1326507024 }
 0x122   : > { %v444_v37 = vsub.s32 32, %v443_v28  ;;  %v448_v39 = vsub.s32 4294967266, %v443_v28  ;;  %v624_v53 = vsel %vm612_vm3, %v606_v6, %v623_v49  ;;  %v445_v58 = vshll.u32 %v3298_v43, %v443_v28 }
 0x123   : > { %v2681_v52 = vmin.u32 %v541_v45, %v3326_v31  ;;  %v3335_v56 = vmul.u32.u64.low %v626_v15, %v621_v51  ;;  %v3336_v30 = vmul.u32.u64.high %v626_v15, %v621_v51, %v3335_v56  ;;  %v625_v60 = vsel %vm611_vm2, %v622_v42, %v624_v53 }
 0x124   : > { %v446_v9 = vshrl.u32 %v428_v63, %v444_v37  ;;  %v449_v47 = vadd.s32 127, %v448_v39  ;;  %v3341_v62 = vmul.u32.u64.low %v626_v15, %v625_v60  ;;  %v3342_v63 = vmul.u32.u64.high %v626_v15, %v625_v60, %v3341_v62 }
 0x125   : > { %v543_v61 = vclz %v2681_v52  ;;  %v685_v0 = vshrl.u32 %v684_v16, 23  ;;  %v617_v5 = vsel %vm611_vm2, %v614_v41, %v616_v33  ;;  %v636_v6 = vadd.s32 1, %v3336_v30 }
 0x126   : > { %v450_v59 = vshll.u32 %v449_v47, 23  ;;  %v447_v2 = vor.u32 %v446_v9, %v445_v58  ;;  %v458_v18 = vsub.s32 4, %v3280_v20  ;;  %v681_v43 = vand.u32 2147483647, %v3206_v36 }
 0x127   : > { %v2682_v7 = vadd.s32 4294967294, %v543_v61  ;;  %v2688_v13 = vadd.s32 4294967169, %v685_v0  ;;  %v633_v21 = vmul.u32 %v626_v15, %v617_v5  ;;  %vm635_vm5 = vc.u32 %v3342_v63, %v3335_v56 }
 0x128   : > { %v451_v3 = vor.u32 4788187, %v450_v59  ;;  %vm374_vm6 = vcmp.lt.s32.totalorder %v3186_v11, 0  ;;  %v454_v16 = vcvt.s32.f32 %v447_v2  ;;  %v637_v25 = vsel %vm635_vm5, %v636_v6, %v3336_v30 }
 0x129   : > { %vm2683_vm4 = vcmp.lt.s32.totalorder %v2682_v7, 0  ;;  %v691_v24 = vadd.s32 1, %v2688_v13  ;;  %v531_v27 = vadd.s32 %v3285_v23, %v3291_v29  ;;  %v638_v37 = vadd.s32 %v637_v25, %v633_v21 }
 0x12a   : > { %v452_v14 = vand.u32 2147483647, %v451_v3  ;;  %v546_v50 = vsel %vm2683_vm4, 0, %v2682_v7  ;;  %v459_v15 = vsel %vm374_vm6, %v458_v18, %v3280_v20  ;;  %v688_v41 = vand.u32 8388607, %v681_v43 }
 0x12b   : > { %v547_v28 = vsub.s32 32, %v546_v50  ;;  %v551_v32 = vsub.s32 4294967266, %v546_v50  ;;  %vm692_vm7 = vcmp.gt.s32.totalorder %v691_v24, 0  ;;  %v639_v34 = vadd.s32 536870912, %v638_v37 }
 0x12c   : > { %v455_v39 = vmul.f32 %v454_v16, %v452_v14  ;;  %v693_v42 = vsel %vm692_vm7, %v691_v24, 0  ;;  %vm3361_vm8 = vcmp.le.f32.partialorder %v372_v12, 0.7853982  ;;  %v548_v29 = vshll.u32 %v3326_v31, %v546_v50 }
 0x12d   : > { %v549_v45 = vshrl.u32 %v531_v27, %v547_v28  ;;  %v552_v33 = vadd.s32 127, %v551_v32  ;;  %v695_v9 = vand.u32 31, %v693_v42  ;;  %v3368_v20 = vsel %vm3361_vm8, 0, %v459_v15 }
 0x12e   : > { %v561_v51 = vsub.s32 4, %v3317_v4  ;;  %v3371_v49 = vshrl.u32 %v639_v34, 30  ;;  %v784_v30 = vand.u32 2147483647, %v3219_v57  ;;  %v787_v12 = vand.u32 2139095040, %v3219_v57 }
 0x12f   : > { %v553_v47 = vshll.u32 %v552_v33, 23  ;;  %v550_v52 = vor.u32 %v549_v45, %v548_v29  ;;  %v696_v53 = vsub.s32 32, %v695_v9  ;;  %v456_v58 = vxor.u32 2147483648, %v455_v39 }
 0x130   : > { %v641_v31 = vshll.u32 %v3371_v49, 30  ;;  %v689_v60 = vor.u32 8388608, %v688_v41  ;;  %v698_v61 = vshll.u32 %v3063_v38, %v695_v9  ;;  %v701_v0 = vshll.u32 %v4281_v40, %v695_v9 }
 0x131   : > { %v554_v59 = vor.u32 4788187, %v553_v47  ;;  %v699_v62 = vshrl.u32 %v4281_v40, %v696_v53  ;;  %v702_v2 = vshrl.u32 %v4279_v44, %v696_v53  ;;  %v704_v7 = vshll.u32 %v4279_v44, %v695_v9 }
 0x132   : > { %v3380_v5 = vsub.s32 %v638_v37, %v641_v31  ;;  %v705_v6 = vshrl.u32 %v4283_v46, %v696_v53  ;;  %v557_v13 = vcvt.s32.f32 %v550_v52  ;;  %v694_v14 = vshrl.u32 %v693_v42, 5 }
 0x133   : > { %v555_v3 = vand.u32 2147483647, %v554_v59  ;;  %v700_v18 = vor.u32 %v699_v62, %v698_v61  ;;  %v788_v21 = vshrl.u32 %v787_v12, 23  ;;  %v703_v16 = vor.u32 %v702_v2, %v701_v0 }
 0x134   : > { %v644_v24 = vsub.s32 0, %v3380_v5  ;;  %v706_v50 = vor.u32 %v705_v6, %v704_v7  ;;  %v707_v25 = vshll.u32 %v4283_v46, %v695_v9  ;;  %vm477_vm9 = vcmp.lt.s32.totalorder %v3192_v17, 0 }
 0x135   : > { %v558_v27 = vmul.f32 %v557_v13, %v555_v3  ;;  %v708_v28 = vshrl.u32 %v3067_v48, %v696_v53  ;;  %v710_v32 = vshll.u32 %v3067_v48, %v695_v9  ;;  %v711_v37 = vshrl.u32 %v4286_v55, %v696_v53 }
 0x136   : > { %v457_v15 = vsel %vm374_vm6, %v456_v58, %v455_v39  ;;  %v634_v41 = vadd.s32 %v3335_v56, %v3342_v63  ;;  %v2685_v45 = vmin.u32 %v644_v24, %v3380_v5  ;;  %v729_v33 = vshll.u32 %v689_v60, 8 }
 0x137   : > { %v709_v34 = vor.u32 %v708_v28, %v707_v25  ;;  %v712_v42 = vor.u32 %v711_v37, %v710_v32  ;;  %vm713_vm10 = vcmp.lt.s32.totalorder %v694_v14, 1  ;;  %vm716_vm11 = vcmp.lt.s32.totalorder %v694_v14, 4 }
 0x138   : > { %v646_v29 = vclz %v2685_v45  ;;  %v718_v47 = vsel %vm716_vm11, %v706_v50, 2102212464  ;;  %v721_v52 = vsel %vm713_vm10, %v700_v18, %v703_v16  ;;  %v2692_v9 = vadd.s32 4294967169, %v788_v21 }
 0x139   : > { %v559_v12 = vxor.u32 2147483648, %v558_v27  ;;  %v697_v59 = vshrl.u32 %v3063_v38, %v696_v53  ;;  %vm715_vm12 = vcmp.lt.s32.totalorder %v694_v14, 3  ;;  %v722_v39 = vsel %vm716_vm11, %v709_v34, 920167782 }
 0x13a   : > { %vm3400_vm13 = vcmp.le.f32.partialorder %v475_v19, 0.7853982  ;;  %v2686_v63 = vadd.s32 4294967294, %v646_v29  ;;  %vm714_vm14 = vcmp.lt.s32.totalorder %v694_v14, 2  ;;  %v723_v58 = vsel %vm715_vm12, %v706_v50, %v722_v39 }
 0x13b   : > { %v725_v31 = vsel %vm713_vm10, %v703_v16, %v706_v50  ;;  %v717_v60 = vsel %vm713_vm10, %v697_v59, %v700_v18  ;;  %v719_v61 = vsel %vm715_vm12, %v703_v16, %v718_v47  ;;  %v724_v62 = vsel %vm714_vm14, %v721_v52, %v723_v58 }
 0x13c   : > { %v726_v0 = vsel %vm716_vm11, %v712_v42, 1326507024  ;;  %vm2687_vm15 = vcmp.lt.s32.totalorder %v2686_v63, 0  ;;  %v3406_v2 = vmul.u32.u64.low %v729_v33, %v724_v62  ;;  %v3407_v3 = vmul.u32.u64.high %v729_v33, %v724_v62, %v3406_v2 }
 0x13d   : > { %v727_v53 = vsel %vm715_vm12, %v709_v34, %v726_v0  ;;  %v649_v19 = vsel %vm2687_vm15, 0, %v2686_v63  ;;  %v3413_v6 = vand.u32 8388607, %v784_v30  ;;  %v794_v13 = vadd.s32 1, %v2692_v9 }
 0x13e   : > { %v728_v7 = vsel %vm714_vm14, %v725_v31, %v727_v53  ;;  %v460_v18 = vsel %vm3361_vm8, %v3186_v11, %v457_v15  ;;  %v560_v21 = vsel %vm477_vm9, %v559_v12, %v558_v27  ;;  %v650_v24 = vsub.s32 32, %v649_v19 }
 0x13f   : > { %v654_v16 = vsub.s32 4294967266, %v649_v19  ;;  %v720_v50 = vsel %vm714_vm14, %v717_v60, %v719_v61  ;;  %v3421_v25 = vmul.u32.u64.low %v729_v33, %v728_v7  ;;  %v3422_v28 = vmul.u32.u64.high %v729_v33, %v728_v7, %v3421_v25 }
 0x140   : > { %vm795_vm0 = vcmp.gt.s32.totalorder %v794_v13, 0  ;;  %v652_v32 = vshrl.u32 %v634_v41, %v650_v24  ;;  %v739_v45 = vadd.s32 1, %v3407_v3  ;;  %2961 = vcosq.f32 %v460_v18 }
 0x141   : > { %v655_v37 = vadd.s32 127, %v654_v16  ;;  %v796_v34 = vsel %vm795_vm0, %v794_v13, 0  ;;  %v3426_v23 = vand.u32 3, %v3368_v20  ;;  %v3433_v14 = vsel %vm477_vm9, %v561_v51, %v3317_v4 }
 0x142   : > { %vm580_vm1 = vcmp.lt.s32.totalorder %v3200_v26, 0  ;;  %v798_v27 = vand.u32 31, %v796_v34  ;;  %2963 = vsinq.f32 %v460_v18  ;;  %v651_v15 = vshll.u32 %v3380_v5, %v649_v19 }
 0x143   : > { %v656_v41 = vshll.u32 %v655_v37, 23  ;;  %v664_v42 = vsub.s32 4, %v3371_v49  ;;  %v3441_v29 = vsel %vm3400_vm13, %v3192_v17, %v560_v21  ;;  %v736_v47 = vmul.u32 %v729_v33, %v720_v50 }
 0x144   : > { %vm738_vm2 = vc.u32 %v3422_v28, %v3406_v2  ;;  %v799_v4 = vsub.s32 32, %v798_v27  ;;  %v653_v51 = vor.u32 %v652_v32, %v651_v15  ;;  %v792_v12 = vor.u32 8388608, %v3413_v6 }
 0x145   : > { %v657_v52 = vor.u32 4788187, %v656_v41  ;;  %v740_v9 = vsel %vm738_vm2, %v739_v45, %v3407_v3  ;;  %v797_v59 = vshrl.u32 %v796_v34, 5  ;;  %v801_v31 = vshll.u32 %v3063_v38, %v798_v27 }
 0x146   : > { %v741_v5 = vadd.s32 %v740_v9, %v736_v47  ;;  %v802_v39 = vshrl.u32 %v4281_v40, %v799_v4  ;;  %v805_v63 = vshrl.u32 %v4279_v44, %v799_v4  ;;  %v804_v33 = vshll.u32 %v4281_v40, %v798_v27 }
 0x147   : > { %v658_v58 = vand.u32 2147483647, %v657_v52  ;;  %v808_v60 = vshrl.u32 %v4283_v46, %v799_v4  ;;  %v807_v62 = vshll.u32 %v4279_v44, %v798_v27  ;;  %v810_v0 = vshll.u32 %v4283_v46, %v798_v27 }
 0x148   : > { %v742_v61 = vadd.s32 536870912, %v741_v5  ;;  %v811_v53 = vshrl.u32 %v3067_v48, %v799_v4  ;;  %v660_v3 = vcvt.s32.f32 %v653_v51  ;;  %v803_v19 = vor.u32 %v802_v39, %v801_v31 }
 0x149   : > { %v806_v7 = vor.u32 %v805_v63, %v804_v33  ;;  %v814_v6 = vshrl.u32 %v4286_v55, %v799_v4  ;;  %v809_v18 = vor.u32 %v808_v60, %v807_v62  ;;  %v813_v24 = vshll.u32 %v3067_v48, %v798_v27 }
 0x14a   : > { %v743_v13 = vshrl.u32 %v742_v61, 30  ;;  %v812_v21 = vor.u32 %v811_v53, %v810_v0  ;;  %2965 = vcosq.f32 %v3441_v29  ;;  %v661_v16 = vmul.f32 %v660_v3, %v658_v58  ;;  %v3462_v32 = vpop.eup %2961 }
 0x14b   : > { %v665_v50 = vsel %vm580_vm1, %v664_v42, %v3371_v49  ;;  %v887_v25 = vand.u32 2147483647, %v3227_v10  ;;  %vm3466_vm3 = vcmp.le.f32.partialorder %v578_v22, 0.7853982  ;;  %v815_v34 = vor.u32 %v814_v6, %v813_v24 }
 0x14c   : > { %v744_v45 = vshll.u32 %v743_v13, 30  ;;  %vm816_vm4 = vcmp.lt.s32.totalorder %v797_v59, 1  ;;  %vm819_vm5 = vcmp.lt.s32.totalorder %v797_v59, 4  ;;  %v3470_v27 = vpop.eup %2963  ;;  %v832_v41 = vshll.u32 %v792_v12, 8 }
 0x14d   : > { %v824_v15 = vsel %vm816_vm4, %v803_v19, %v806_v7  ;;  %v825_v49 = vsel %vm819_vm5, %v812_v21, 920167782  ;;  %v890_v42 = vand.u32 2139095040, %v3227_v10  ;;  %vm683_vm6 = vcmp.lt.s32.totalorder %v3206_v36, 0 }
 0x14e   : > { %v3476_v47 = vsub.s32 %v741_v5, %v744_v45  ;;  %v800_v22 = vshrl.u32 %v3063_v38, %v799_v4  ;;  %vm818_vm7 = vcmp.lt.s32.totalorder %v797_v59, 3  ;;  %v821_v51 = vsel %vm819_vm5, %v809_v18, 2102212464 }
 0x14f   : > { %v662_v52 = vxor.u32 2147483648, %v661_v16  ;;  %vm817_vm8 = vcmp.lt.s32.totalorder %v797_v59, 2  ;;  %v826_v9 = vsel %vm818_vm7, %v809_v18, %v825_v49  ;;  %v828_v39 = vsel %vm816_vm4, %v806_v7, %v809_v18 }
 0x150   : > { %v747_v63 = vsub.s32 0, %v3476_v47  ;;  %v820_v12 = vsel %vm816_vm4, %v800_v22, %v803_v19  ;;  %v827_v58 = vsel %vm817_vm8, %v824_v15, %v826_v9  ;;  %v829_v31 = vsel %vm819_vm5, %v815_v34, 1326507024 }
 0x151   : > { %v822_v5 = vsel %vm818_vm7, %v806_v7, %v821_v51  ;;  %v830_v33 = vsel %vm818_vm7, %v812_v21, %v829_v31  ;;  %v3485_v60 = vmul.u32.u64.low %v832_v41, %v827_v58  ;;  %v3486_v4 = vmul.u32.u64.high %v832_v41, %v827_v58, %v3485_v60 }
 0x152   : > { %vm3491_vm9 = vcmp.le.f32.partialorder %v681_v43, 0.7853982  ;;  %v2689_v62 = vmin.u32 %v747_v63, %v3476_v47  ;;  %v831_v0 = vsel %vm817_vm8, %v828_v39, %v830_v33  ;;  %v891_v53 = vshrl.u32 %v890_v42, 23 }
 0x153   : > { %v894_v3 = vand.u32 8388607, %v887_v25  ;;  %v663_v19 = vsel %vm580_vm1, %v662_v52, %v661_v16  ;;  %v767_v7 = vsub.s32 4, %v743_v13  ;;  %v823_v43 = vsel %vm817_vm8, %v820_v12, %v822_v5 }
 0x154   : > { %v3501_v6 = vmul.u32.u64.low %v832_v41, %v831_v0  ;;  %v3502_v18 = vmul.u32.u64.high %v832_v41, %v831_v0, %v3501_v6  ;;  %v749_v21 = vclz %v2689_v62  ;;  %v2696_v24 = vadd.s32 4294967169, %v891_v53  ;;  %v3506_v34 = vpop.eup %2965 }
 0x155   : > { %v993_v45 = vand.u32 2139095040, %v3247_v35  ;;  %v3511_v15 = vsel %vm3400_vm13, 0, %v3433_v14  ;;  %2967 = vsinq.f32 %v3441_v29  ;;  %v3516_v16 = vsel %vm3466_vm3, 0, %v665_v50 }
 0x156   : > { %v842_v49 = vadd.s32 1, %v3486_v4  ;;  %v737_v59 = vadd.s32 %v3406_v2, %v3422_v28  ;;  %v2690_v42 = vadd.s32 4294967294, %v749_v21  ;;  %v897_v22 = vadd.s32 1, %v2696_v24 }
 0x157   : > { %v994_v51 = vshrl.u32 %v993_v45, 23  ;;  %v666_v56 = vsel %vm3466_vm3, %v3200_v26, %v663_v19  ;;  %v768_v14 = vsel %vm683_vm6, %v767_v7, %v743_v13  ;;  %v839_v29 = vmul.u32 %v832_v41, %v823_v43 }
 0x158   : > { %vm841_vm10 = vc.u32 %v3502_v18, %v3485_v60  ;;  %vm2691_vm11 = vcmp.lt.s32.totalorder %v2690_v42, 0  ;;  %v895_v52 = vor.u32 8388608, %v894_v3  ;;  %vm898_vm12 = vcmp.gt.s32.totalorder %v897_v22, 0 }
 0x159   : > { %v843_v50 = vsel %vm841_vm10, %v842_v49, %v3486_v4  ;;  %v752_v2 = vsel %vm2691_vm11, 0, %v2690_v42  ;;  %v899_v9 = vsel %vm898_vm12, %v897_v22, 0  ;;  %v4285_v39 = vand.u32 2147483647, %v3247_v35 }
 0x15a   : > { %v844_v28 = vadd.s32 %v843_v50, %v839_v29  ;;  %v753_v63 = vsub.s32 32, %v752_v2  ;;  %v757_v37 = vsub.s32 4294967266, %v752_v2  ;;  %v3530_v12 = vshrl.u32 %v899_v9, 5 }
 0x15b   : > { %v2700_v58 = vadd.s32 4294967169, %v994_v51  ;;  %2969 = vcosq.f32 %v666_v56  ;;  %v3534_v13 = vsel %vm3491_vm9, 0, %v768_v14  ;;  %v901_v31 = vand.u32 31, %v899_v9 }
 0x15c   : > { %v845_v41 = vadd.s32 536870912, %v844_v28  ;;  %2971 = vsinq.f32 %v666_v56  ;;  %v754_v5 = vshll.u32 %v3476_v47, %v752_v2  ;;  %v755_v33 = vshrl.u32 %v737_v59, %v753_v63 }
 0x15d   : > { %v758_v4 = vadd.s32 127, %v757_v37  ;;  %v902_v0 = vsub.s32 32, %v901_v31  ;;  %v3539_v53 = vshll.u32 %v895_v52, 8  ;;  %v3543_v3 = vand.u32 8388607, %v4285_v39 }
 0x15e   : > { %v3537_v62 = vshrl.u32 %v845_v41, 30  ;;  %v756_v19 = vor.u32 %v755_v33, %v754_v5  ;;  %vm919_vm13 = vcmp.lt.s32.totalorder %v3530_v12, 1  ;;  %v1000_v6 = vadd.s32 1, %v2700_v58 }
 0x15f   : > { %v759_v7 = vshll.u32 %v758_v4, 23  ;;  %v3546_v21 = vpop.eup %2967  ;;  %v904_v43 = vshll.u32 %v3063_v38, %v901_v31  ;;  %v905_v24 = vshrl.u32 %v4281_v40, %v902_v0  ;;  %v907_v45 = vshll.u32 %v4281_v40, %v901_v31 }
 0x160   : > { %v847_v47 = vshll.u32 %v3537_v62, 30  ;;  %vm920_vm14 = vcmp.lt.s32.totalorder %v3530_v12, 2  ;;  %v908_v59 = vshrl.u32 %v4279_v44, %v902_v0  ;;  %v910_v42 = vshll.u32 %v4279_v44, %v901_v31 }
 0x161   : > { %v760_v49 = vor.u32 4788187, %v759_v7  ;;  %v911_v22 = vshrl.u32 %v4283_v46, %v902_v0  ;;  %v906_v56 = vor.u32 %v905_v24, %v904_v43  ;;  %v913_v14 = vshll.u32 %v4283_v46, %v901_v31 }
 0x162   : > { %v3556_v51 = vsub.s32 %v844_v28, %v847_v47  ;;  %v914_v29 = vshrl.u32 %v3067_v48, %v902_v0  ;;  %v763_v52 = vcvt.s32.f32 %v756_v19  ;;  %v909_v2 = vor.u32 %v908_v59, %v907_v45 }
 0x163   : > { %v761_v50 = vand.u32 2147483647, %v760_v49  ;;  %v912_v9 = vor.u32 %v911_v22, %v910_v42  ;;  %v916_v58 = vshll.u32 %v3067_v48, %v901_v31  ;;  %v917_v41 = vshrl.u32 %v4286_v55, %v902_v0 }
 0x164   : > { %v850_v63 = vsub.s32 0, %v3556_v51  ;;  %v915_v37 = vor.u32 %v914_v29, %v913_v14  ;;  %vm786_vm15 = vcmp.lt.s32.totalorder %v3219_v57, 0  ;;  %v903_v28 = vshrl.u32 %v3063_v38, %v902_v0 }
 0x165   : > { %v764_v5 = vmul.f32 %v763_v52, %v761_v50  ;;  %vm921_vm0 = vcmp.lt.s32.totalorder %v3530_v12, 3  ;;  %vm922_vm1 = vcmp.lt.s32.totalorder %v3530_v12, 4  ;;  %v3567_v33 = vpop.eup %2969  ;;  %v918_v19 = vor.u32 %v917_v41, %v916_v58 }
 0x166   : > { %v2693_v4 = vmin.u32 %v850_v63, %v3556_v51  ;;  %v924_v7 = vsel %vm922_vm1, %v912_v9, 2102212464  ;;  %v927_v31 = vsel %vm919_vm13, %v906_v56, %v909_v2  ;;  %v3572_v47 = vpop.eup %2971  ;;  %v923_v24 = vsel %vm919_vm13, %v903_v28, %v906_v56 }
 0x167   : > { %v765_v43 = vxor.u32 2147483648, %v764_v5  ;;  %v928_v0 = vsel %vm922_vm1, %v915_v37, 920167782  ;;  %v931_v45 = vsel %vm919_vm13, %v909_v2, %v912_v9  ;;  %v925_v59 = vsel %vm921_vm0, %v909_v2, %v924_v7 }
 0x168   : > { %v852_v49 = vclz %v2693_v4  ;;  %v929_v42 = vsel %vm921_vm0, %v912_v9, %v928_v0  ;;  %v932_v22 = vsel %vm922_vm1, %v918_v19, 1326507024  ;;  %v998_v56 = vor.u32 8388608, %v3543_v3 }
 0x169   : > { %v930_v14 = vsel %vm920_vm14, %v927_v31, %v929_v42  ;;  %v933_v29 = vsel %vm921_vm0, %v915_v37, %v932_v22  ;;  %v4278_v50 = vand.u32 2147483647, %v3263_v54  ;;  %v870_v63 = vsub.s32 4, %v3537_v62 }
 0x16a   : > { %v2694_v52 = vadd.s32 4294967294, %v852_v49  ;;  %v934_v2 = vsel %vm920_vm14, %v931_v45, %v933_v29  ;;  %vm1001_vm2 = vcmp.gt.s32.totalorder %v1000_v6, 0  ;;  %v926_v9 = vsel %vm920_vm14, %v923_v24, %v925_v59 }
 0x16b   : > { %v3594_v58 = vmul.u32.u64.low %v3539_v53, %v934_v2  ;;  %v3595_v41 = vmul.u32.u64.high %v3539_v53, %v934_v2, %v3594_v58  ;;  %v1002_v28 = vsel %vm1001_vm2, %v1000_v6, 0  ;;  %v766_v3 = vsel %vm683_vm6, %v765_v43, %v764_v5 }
 0x16c   : > { %vm2695_vm3 = vcmp.lt.s32.totalorder %v2694_v52, 0  ;;  %v3600_v37 = vmul.u32.u64.low %v3539_v53, %v930_v14  ;;  %v3601_v4 = vmul.u32.u64.high %v3539_v53, %v930_v14, %v3600_v37  ;;  %v840_v19 = vadd.s32 %v3485_v60, %v3502_v18 }
 0x16d   : > { %v855_v7 = vsel %vm2695_vm3, 0, %v2694_v52  ;;  %v1004_v12 = vand.u32 31, %v1002_v28  ;;  %v1096_v31 = vand.u32 2139095040, %v3263_v54  ;;  %v3610_v6 = vsel %vm786_vm15, %v870_v63, %v3537_v62 }
 0x16e   : > { %v856_v24 = vsub.s32 32, %v855_v7  ;;  %v860_v0 = vsub.s32 4294967266, %v855_v7  ;;  %v3612_v5 = vshll.u32 %v998_v56, 8  ;;  %v3617_v43 = vsel %vm3491_vm9, %v3206_v36, %v766_v3 }
 0x16f   : > { %v942_v60 = vmul.u32 %v3539_v53, %v926_v9  ;;  %vm944_vm4 = vc.u32 %v3595_v41, %v3600_v37  ;;  %v1005_v18 = vsub.s32 32, %v1004_v12  ;;  %v857_v45 = vshll.u32 %v3556_v51, %v855_v7 }
 0x170   : > { %v858_v49 = vshrl.u32 %v840_v19, %v856_v24  ;;  %v861_v59 = vadd.s32 127, %v860_v0  ;;  %v945_v62 = vadd.s32 1, %v3601_v4  ;;  %v1007_v42 = vshll.u32 %v3063_v38, %v1004_v12 }
 0x171   : > { %v1008_v22 = vshrl.u32 %v4281_v40, %v1005_v18  ;;  %v1010_v61 = vshll.u32 %v4281_v40, %v1004_v12  ;;  %v1011_v14 = vshrl.u32 %v4279_v44, %v1005_v18  ;;  %v1014_v52 = vshrl.u32 %v4283_v46, %v1005_v18 }
 0x172   : > { %v859_v29 = vor.u32 %v858_v49, %v857_v45  ;;  %v862_v53 = vshll.u32 %v861_v59, 23  ;;  %v946_v56 = vsel %vm944_vm4, %v945_v62, %v3601_v4  ;;  %v1003_v51 = vshrl.u32 %v1002_v28, 5 }
 0x173   : > { %v947_v63 = vadd.s32 %v946_v56, %v942_v60  ;;  %v1009_v2 = vor.u32 %v1008_v22, %v1007_v42  ;;  %v1013_v9 = vshll.u32 %v4279_v44, %v1004_v12  ;;  %vm3633_vm5 = vcmp.le.f32.partialorder %v784_v30, 0.7853982 }
 0x174   : > { %v863_v3 = vor.u32 4788187, %v862_v53  ;;  %v1012_v19 = vor.u32 %v1011_v14, %v1010_v61  ;;  %v1016_v7 = vshll.u32 %v4283_v46, %v1004_v12  ;;  %v1017_v24 = vshrl.u32 %v3067_v48, %v1005_v18 }
 0x175   : > { %v948_v4 = vadd.s32 536870912, %v947_v63  ;;  %v1015_v0 = vor.u32 %v1014_v52, %v1013_v9  ;;  %v1019_v60 = vshll.u32 %v3067_v48, %v1004_v12  ;;  %v1020_v28 = vshrl.u32 %v4286_v55, %v1005_v18 }
 0x176   : > { %v864_v45 = vand.u32 2147483647, %v863_v3  ;;  %v866_v49 = vcvt.s32.f32 %v859_v29  ;;  %v1018_v59 = vor.u32 %v1017_v24, %v1016_v7  ;;  %v1097_v62 = vshrl.u32 %v1096_v31, 23 }
 0x177   : > { %vm889_vm6 = vcmp.lt.s32.totalorder %v3227_v10, 0  ;;  %v949_v30 = vshrl.u32 %v948_v4, 30  ;;  %v1006_v42 = vshrl.u32 %v3063_v38, %v1005_v18  ;;  %v1021_v22 = vor.u32 %v1020_v28, %v1019_v60 }
 0x178   : > { %vm1025_vm7 = vcmp.lt.s32.totalorder %v1003_v51, 4  ;;  %v867_v61 = vmul.f32 %v866_v49, %v864_v45  ;;  %vm1022_vm8 = vcmp.lt.s32.totalorder %v1003_v51, 1  ;;  %vm1024_vm9 = vcmp.lt.s32.totalorder %v1003_v51, 3 }
 0x179   : > { %v1031_v14 = vsel %vm1025_vm7, %v1018_v59, 920167782  ;;  %v950_v53 = vshll.u32 %v949_v30, 30  ;;  %v1027_v12 = vsel %vm1025_vm7, %v1015_v0, 2102212464  ;;  %v1030_v56 = vsel %vm1022_vm8, %v1009_v2, %v1012_v19 }
 0x17a   : > { %v1032_v29 = vsel %vm1024_vm9, %v1015_v0, %v1031_v14  ;;  %v868_v52 = vxor.u32 2147483648, %v867_v61  ;;  %vm3648_vm10 = vcmp.le.f32.partialorder %v887_v25, 0.7853982  ;;  %vm1023_vm11 = vcmp.lt.s32.totalorder %v1003_v51, 2 }
 0x17b   : > { %v1034_v18 = vsel %vm1022_vm8, %v1012_v19, %v1015_v0  ;;  %v1100_v9 = vand.u32 8388607, %v4278_v50  ;;  %v3654_v3 = vsub.s32 %v947_v63, %v950_v53  ;;  %v973_v7 = vsub.s32 4, %v949_v30 }
 0x17c   : > { %v1026_v24 = vsel %vm1022_vm8, %v1006_v42, %v1009_v2  ;;  %v1035_v4 = vsel %vm1025_vm7, %v1021_v22, 1326507024  ;;  %v1028_v60 = vsel %vm1024_vm9, %v1012_v19, %v1027_v12  ;;  %v1033_v28 = vsel %vm1023_vm11, %v1030_v56, %v1032_v29 }
 0x17d   : > { %v1036_v25 = vsel %vm1024_vm9, %v1018_v59, %v1035_v4  ;;  %v2704_v45 = vadd.s32 4294967169, %v1097_v62  ;;  %v869_v49 = vsel %vm786_vm15, %v868_v52, %v867_v61  ;;  %v3665_v0 = vsel %vm3633_vm5, 0, %v3610_v6  ;;  %v2252_v62 = vld [vmem:[%s4274_s3 + $0x8] sm:$0xff]  ;;  %v2254_v6 = vld [vmem:[%s4274_s3 + $0x18] sm:$0xff] }
 0x17e   : > { %v953_v63 = vsub.s32 0, %v3654_v3  ;;  %v1037_v2 = vsel %vm1023_vm11, %v1034_v18, %v1036_v25  ;;  %2973 = vcosq.f32 %v3617_v43  ;;  %v1029_v61 = vsel %vm1023_vm11, %v1026_v24, %v1028_v60 }
 0x17f   : > { %v3671_v19 = vmul.u32.u64.low %v3612_v5, %v1037_v2  ;;  %v3672_v42 = vmul.u32.u64.high %v3612_v5, %v1037_v2, %v3671_v19  ;;  %v1103_v59 = vadd.s32 1, %v2704_v45  ;;  %v3690_v12 = vsel %vm3633_vm5, %v3219_v57, %v869_v49 }
 0x180   : > { %v2697_v22 = vmin.u32 %v953_v63, %v3654_v3  ;;  %v3683_v14 = vmul.u32.u64.low %v3612_v5, %v1033_v28  ;;  %v3684_v53 = vmul.u32.u64.high %v3612_v5, %v1033_v28, %v3683_v14  ;;  %v974_v56 = vsel %vm889_vm6, %v973_v7, %v949_v30 }
 0x181   : > { %v1101_v29 = vor.u32 8388608, %v1100_v9  ;;  %vm1104_vm12 = vcmp.gt.s32.totalorder %v1103_v59, 0  ;;  %2975 = vsinq.f32 %v3617_v43  ;;  %v2818_v18 = vpack.c.bf16 %v2254_v6, %v2252_v62 }
 0x182   : > { %v955_v52 = vclz %v2697_v22  ;;  %v1105_v51 = vsel %vm1104_vm12, %v1103_v59, 0  ;;  %v943_v24 = vadd.s32 %v3600_v37, %v3595_v41  ;;  %v1045_v4 = vmul.u32 %v3612_v5, %v1029_v61 }
 0x183   : > { %vm1047_vm13 = vc.u32 %v3672_v42, %v3683_v14  ;;  %v1107_v58 = vand.u32 31, %v1105_v51  ;;  %2977 = vcosq.f32 %v3690_v12  ;;  %v3703_v30 = vsel %vm3648_vm10, 0, %v974_v56  ;;  %2819 = vmatprep.subr.bf16.mxu1 %v2818_v18 }
 0x184   : > { %v2698_v60 = vadd.s32 4294967294, %v955_v52  ;;  %4305 = vst [vmem:[#allocation6_spill] sm:$0xff] %v3703_v30  ;;  %v1048_v43 = vadd.s32 1, %v3684_v53  ;;  %v3706_v7 = vshll.u32 %v1101_v29, 8  ;;  %v1199_v37 = vand.u32 2139095040, %v3276_v8 }
 0x185   : > { %v1108_v9 = vsub.s32 32, %v1107_v58  ;;  %v3711_v28 = vshrl.u32 %v1105_v51, 5  ;;  %v1110_v25 = vshll.u32 %v3063_v38, %v1107_v58  ;;  %v1113_v2 = vshll.u32 %v4281_v40, %v1107_v58 }
 0x186   : > { %vm2699_vm14 = vcmp.lt.s32.totalorder %v2698_v60, 0  ;;  %v1049_v5 = vsel %vm1047_vm13, %v1048_v43, %v3684_v53  ;;  %v1116_v6 = vshll.u32 %v4279_v44, %v1107_v58  ;;  %v1119_v56 = vshll.u32 %v4283_v46, %v1107_v58 }
 0x187   : > { %v958_v45 = vsel %vm2699_vm14, 0, %v2698_v60  ;;  %v1050_v49 = vadd.s32 %v1049_v5, %v1045_v4  ;;  %v1111_v63 = vshrl.u32 %v4281_v40, %v1108_v9  ;;  %v1114_v62 = vshrl.u32 %v4279_v44, %v1108_v9 }
 0x188   : > { %v959_v19 = vsub.s32 32, %v958_v45  ;;  %v963_v59 = vsub.s32 4294967266, %v958_v45  ;;  %v3718_v22 = vpop.eup %2973  ;;  %v1117_v53 = vshrl.u32 %v4283_v46, %v1108_v9  ;;  %v1120_v29 = vshrl.u32 %v3067_v48, %v1108_v9 }
 0x189   : > { %v1051_v61 = vadd.s32 536870912, %v1050_v49  ;;  %v960_v52 = vshll.u32 %v3654_v3, %v958_v45  ;;  %v1123_v4 = vshrl.u32 %v4286_v55, %v1108_v9  ;;  %vm992_vm15 = vcmp.lt.s32.totalorder %v3247_v35, 0 }
 0x18a   : > { %v961_v51 = vshrl.u32 %v943_v24, %v959_v19  ;;  %v964_v18 = vadd.s32 127, %v963_v59  ;;  %v1112_v43 = vor.u32 %v1111_v63, %v1110_v25  ;;  %v1115_v5 = vor.u32 %v1114_v62, %v1113_v2  ;;  %v2249_v63 = vld [vmem:[%s4273_s2 + $0x70] sm:$0xff] }
 0x18b   : > { %v1052_v60 = vshrl.u32 %v1051_v61, 30  ;;  %v1118_v1 = vor.u32 %v1117_v53, %v1116_v6  ;;  %v3726_v50 = vpop.eup %2975  ;;  %v1121_v41 = vor.u32 %v1120_v29, %v1119_v56  ;;  %v1122_v46 = vshll.u32 %v3067_v48, %v1107_v58 }
 0x18c   : > { %v962_v44 = vor.u32 %v961_v51, %v960_v52  ;;  %v965_v40 = vshll.u32 %v964_v18, 23  ;;  %v1109_v3 = vshrl.u32 %v3063_v38, %v1108_v9  ;;  %vm1125_vm0 = vcmp.lt.s32.totalorder %v3711_v28, 1  ;;  %v2251_v52 = vld [vmem:[%s4274_s3] sm:$0xff]  ;;  %v2253_v51 = vld [vmem:[%s4274_s3 + $0x10] sm:$0xff] }
 0x18d   : > { %v1053_v39 = vshll.u32 %v1052_v60, 30  ;;  %v1200_v24 = vshrl.u32 %v1199_v37, 23  ;;  %v3731_v45 = vpop.eup %2977  ;;  %v1124_v59 = vor.u32 %v1123_v4, %v1122_v46  ;;  %vm1126_vm1 = vcmp.lt.s32.totalorder %v3711_v28, 2 }
 0x18e   : > { %v966_v19 = vor.u32 4788187, %v965_v40  ;;  %vm1128_vm2 = vcmp.lt.s32.totalorder %v3711_v28, 4  ;;  %v4306_v25 = vand.u32 2147483647, %v3247_v35  ;;  %v1076_v9 = vsub.s32 4, %v1052_v60 }
 0x18f   : > { %v3741_v58 = vsub.s32 %v1050_v49, %v1053_v39  ;;  %v1130_v37 = vsel %vm1128_vm2, %v1118_v1, 2102212464  ;;  %v1133_v40 = vsel %vm1125_vm0, %v1112_v43, %v1115_v5  ;;  %v969_v2 = vcvt.s32.f32 %v962_v44 }
 0x190   : > { %vm3737_vm3 = vcmp.le.f32.partialorder %v4306_v25, 0.7853982  ;;  %v967_v46 = vand.u32 2147483647, %v966_v19  ;;  %vm1127_vm4 = vcmp.lt.s32.totalorder %v3711_v28, 3  ;;  %v1129_v39 = vsel %vm1125_vm0, %v1109_v3, %v1112_v43  ;;  %v2238_v3 = vld [vmem:[%s4273_s2 + $0x18] sm:$0xff] }
 0x191   : > { %v1134_v62 = vsel %vm1128_vm2, %v1121_v41, 920167782  ;;  %v1056_v6 = vsub.s32 0, %v3741_v58  ;;  %v1137_v61 = vsel %vm1125_vm0, %v1115_v5, %v1118_v1  ;;  %v1131_v56 = vsel %vm1127_vm4, %v1115_v5, %v1130_v37  ;;  %v2236_v5 = vld [vmem:[%s4273_s2 + $0x8] sm:$0xff] }
 0x192   : > { %v1135_v49 = vsel %vm1127_vm4, %v1118_v1, %v1134_v62  ;;  %v970_v53 = vmul.f32 %v969_v2, %v967_v46  ;;  %v1138_v44 = vsel %vm1128_vm2, %v1124_v59, 1326507024  ;;  %v1077_v19 = vsel %vm992_vm15, %v1076_v9, %v1052_v60  ;;  %v2237_v46 = vld [vmem:[%s4273_s2 + $0x10] sm:$0xff]  ;;  %v2258_v9 = vld [vmem:[%s4274_s3 + $0x38] sm:$0xff] }
 0x193   : > { %v1136_v29 = vsel %vm1126_vm1, %v1133_v40, %v1135_v49  ;;  %v2701_v18 = vmin.u32 %v1056_v6, %v3741_v58  ;;  %v1139_v4 = vsel %vm1127_vm4, %v1121_v41, %v1138_v44  ;;  %v2708_v41 = vadd.s32 4294967169, %v1200_v24  ;;  %v2235_v40 = vld [vmem:[%s4273_s2] sm:$0xff]  ;;  %v2256_v24 = vld [vmem:[%s4274_s3 + $0x28] sm:$0xff] }
 0x194   : > { %v3767_v1 = vmul.u32.u64.low %v3706_v7, %v1136_v29  ;;  %v3768_v43 = vmul.u32.u64.high %v3706_v7, %v1136_v29, %v3767_v1  ;;  %v1140_v59 = vsel %vm1126_vm1, %v1137_v61, %v1139_v4  ;;  %v4309_v25 = vand.u32 2147483647, %v3276_v8  ;;  %v2255_v4 = vld [vmem:[%s4274_s3 + $0x20] sm:$0xff] }
 0x195   : > { %v1058_v2 = vclz %v2701_v18  ;;  %v3790_v62 = vmul.u32.u64.low %v3706_v7, %v1140_v59  ;;  %v3791_v6 = vmul.u32.u64.high %v3706_v7, %v1140_v59, %v3790_v62  ;;  %v2820_v60 = vpack.c.bf16 %v2253_v51, %v2251_v52 }
 0x196   : > { %v1203_v37 = vand.u32 8388607, %v4309_v25  ;;  %2979 = vsinq.f32 %v3690_v12  ;;  %v1132_v49 = vsel %vm1126_vm1, %v1129_v39, %v1131_v56  ;;  %v1206_v61 = vadd.s32 1, %v2708_v41  ;;  %v2257_v12 = vld [vmem:[%s4274_s3 + $0x30] sm:$0xff] }
 0x197   : > { %v3802_v29 = vpack.c.bf16 %v2238_v3, %v2236_v5  ;;  %v971_v44 = vxor.u32 2147483648, %v970_v53  ;;  %v2702_v18 = vadd.s32 4294967294, %v1058_v2  ;;  %v1151_v52 = vadd.s32 1, %v3768_v43  ;;  %2821 = vmatpush1.bf16.msra.mxu1 %v2820_v60  ;;  %v2240_v5 = vld [vmem:[%s4273_s2 + $0x28] sm:$0xff] }
 0x198   : > { %v3805_v51 = vpack.c.bf16 %v2237_v46, %v2235_v40  ;;  %v1046_v28 = vadd.s32 %v3683_v14, %v3672_v42  ;;  %v3817_v39 = vsel %vm3737_vm3, 0, %v1077_v19  ;;  %vm1207_vm5 = vcmp.gt.s32.totalorder %v1206_v61, 0  ;;  %v2242_v42 = vld [vmem:[%s4273_s2 + $0x38] sm:$0xff]  ;;  %v2239_v14 = vld [vmem:[%s4273_s2 + $0x20] sm:$0xff]  ;;  %v2241_v19 = vld [vmem:[%s4273_s2 + $0x30] sm:$0xff] }
 0x199   : > { %4310 = vst [vmem:[#allocation7_spill] sm:$0xff] %v3817_v39  ;;  %2835 = vmatprep.subr.bf16.mxu0 %v3802_v29  ;;  %v2822_v56 = vpack.c.bf16 %v2258_v9, %v2256_v24  ;;  %vm2703_vm7 = vcmp.lt.s32.totalorder %v2702_v18, 0  ;;  %v1148_v3 = vmul.u32 %v3706_v7, %v1132_v49  ;;  %vm1150_vm8 = vc.u32 %v3791_v6, %v3767_v1  ;;  %v2260_v40 = vld [vmem:[%s4274_s3 + $0x48] sm:$0xff]  ;;  %v2262_v46 = vld [vmem:[%s4274_s3 + $0x58] sm:$0xff] }
 0x19a   : > { %v1204_v59 = vor.u32 8388608, %v1203_v37  ;;  %2837 = vmatpush1.bf16.msra.mxu0 %v3805_v51  ;;  %v1061_v41 = vsel %vm2703_vm7, 0, %v2702_v18  ;;  %v1152_v7 = vsel %vm1150_vm8, %v1151_v52, %v3768_v43  ;;  %v1208_v25 = vsel %vm1207_vm5, %v1206_v61, 0 }
 0x19b   : > { %2823 = vmatprep.subr.bf16.mxu1 %v2822_v56  ;;  %v2824_v37 = vpack.c.bf16 %v2257_v12, %v2255_v4  ;;  %v972_v2 = vsel %vm889_vm6, %v971_v44, %v970_v53  ;;  %v1062_v62 = vsub.s32 32, %v1061_v41  ;;  %v1066_v60 = vsub.s32 4294967266, %v1061_v41 }
 0x19c   : > { %v1153_v24 = vadd.s32 %v1152_v7, %v1148_v3  ;;  %v1063_v9 = vshll.u32 %v3741_v58, %v1061_v41  ;;  %v1210_v43 = vand.u32 31, %v1208_v25  ;;  %v3846_v49 = vpack.c.bf16 %v2242_v42, %v2240_v5 }
 0x19d   : > { %2825 = vmatpush1.bf16.msra.mxu1 %v2824_v37  ;;  %v3848_v61 = vpack.c.bf16 %v2241_v19, %v2239_v14  ;;  %v1064_v18 = vshrl.u32 %v1046_v28, %v1062_v62  ;;  %v1067_v52 = vadd.s32 127, %v1066_v60  ;;  %v2826_v12 = vpack.c.bf16 %v2262_v46, %v2260_v40 }
 0x19e   : > { %v1154_v4 = vadd.s32 536870912, %v1153_v24  ;;  %v975_v56 = vsel %vm3648_vm10, %v3227_v10, %v972_v2  ;;  %v3853_v53 = vshrl.u32 %v1208_v25, 5  ;;  %v1211_v44 = vsub.s32 32, %v1210_v43  ;;  %2839 = vmatprep.subr.bf16.mxu0 %v3846_v49 }
 0x19f   : > { %v3855_v3 = vshll.u32 %v1204_v59, 8  ;;  %v1065_v58 = vor.u32 %v1064_v18, %v1063_v9  ;;  %v1068_v5 = vshll.u32 %v1067_v52, 23  ;;  %v1213_v28 = vshll.u32 %v3063_v38, %v1210_v43  ;;  %2841 = vmatpush1.bf16.msra.mxu0 %v3848_v61  ;;  %2827 = vmatprep.subr.bf16.mxu1 %v2826_v12 }
 0x1a0   : > { %v3858_v42 = vshrl.u32 %v1154_v4, 30  ;;  %v3862_v14 = vpop.eup %2979  ;;  %v4311_v31 = vmov 2475754826   ;;  %v4312_v7 = vmov 2131351028   ;;  %v1212_v60 = vshrl.u32 %v3063_v38, %v1211_v44 }
 0x1a1   : > { %v1214_v19 = vshrl.u32 %v4311_v31, %v1211_v44  ;;  %v1216_v41 = vshll.u32 %v4311_v31, %v1210_v43  ;;  %v1217_v59 = vshrl.u32 %v4312_v7, %v1211_v44  ;;  %v4313_v25 = vmov 2102212464  }
 0x1a2   : > { %v1220_v37 = vshrl.u32 %v4313_v25, %v1211_v44  ;;  %v1069_v40 = vor.u32 4788187, %v1068_v5  ;;  %v1156_v46 = vshll.u32 %v3858_v42, 30  ;;  %v1219_v2 = vshll.u32 %v4312_v7, %v1210_v43 }
 0x1a3   : > { %v1222_v62 = vshll.u32 %v4313_v25, %v1210_v43  ;;  %v1215_v9 = vor.u32 %v1214_v19, %v1213_v28  ;;  %v1218_v18 = vor.u32 %v1217_v59, %v1216_v41  ;;  %v1223_v52 = vshrl.u32 %v3067_v48, %v1211_v44 }
 0x1a4   : > { %v1070_v4 = vand.u32 2147483647, %v1069_v40  ;;  %v1072_v12 = vcvt.s32.f32 %v1065_v58  ;;  %v3873_v31 = vsub.s32 %v1153_v24, %v1156_v46  ;;  %v1221_v55 = vor.u32 %v1220_v37, %v1219_v2  ;;  %v2261_v37 = vld [vmem:[%s4274_s3 + $0x50] sm:$0xff]  ;;  %v2244_v40 = vld [vmem:[%s4273_s2 + $0x48] sm:$0xff] }
 0x1a5   : > { %v1224_v39 = vor.u32 %v1223_v52, %v1222_v62  ;;  %v1225_v5 = vshll.u32 %v3067_v48, %v1210_v43  ;;  %v4314_v10 = vmov 1326507024   ;;  %vm1228_vm6 = vcmp.lt.s32.totalorder %v3853_v53, 1  ;;  %v2246_v62 = vld [vmem:[%s4273_s2 + $0x58] sm:$0xff] }
 0x1a6   : > { %v1226_v30 = vshrl.u32 %v4314_v10, %v1211_v44  ;;  %v1073_v7 = vmul.f32 %v1072_v12, %v1070_v4  ;;  %v1159_v25 = vsub.s32 0, %v3873_v31  ;;  %vm1229_vm9 = vcmp.lt.s32.totalorder %v3853_v53, 2  ;;  %v2264_v12 = vld [vmem:[%s4274_s3 + $0x68] sm:$0xff] }
 0x1a7   : > { %vm1230_vm10 = vcmp.lt.s32.totalorder %v3853_v53, 3  ;;  %vm1231_vm11 = vcmp.lt.s32.totalorder %v3853_v53, 4  ;;  %v1232_v24 = vsel %vm1228_vm6, %v1212_v60, %v1215_v9  ;;  %v1236_v58 = vsel %vm1228_vm6, %v1215_v9, %v1218_v18  ;;  %v2243_v60 = vld [vmem:[%s4273_s2 + $0x40] sm:$0xff]  ;;  %v2245_v9 = vld [vmem:[%s4273_s2 + $0x50] sm:$0xff] }
 0x1a8   : > { %v1227_v38 = vor.u32 %v1226_v30, %v1225_v5  ;;  %v1074_v28 = vxor.u32 2147483648, %v1073_v7  ;;  %v2705_v19 = vmin.u32 %v1159_v25, %v3873_v31  ;;  %v1233_v48 = vsel %vm1231_vm11, %v1221_v55, 2102212464  ;;  %v2259_v30 = vld [vmem:[%s4274_s3 + $0x40] sm:$0xff]  ;;  %v2266_v5 = vld [vmem:[%s4274_s3 + $0x78] sm:$0xff] }
 0x1a9   : > { %v1237_v43 = vsel %vm1231_vm11, %v1224_v39, 920167782  ;;  %v1234_v10 = vsel %vm1230_vm10, %v1218_v18, %v1233_v48  ;;  %v1240_v41 = vsel %vm1228_vm6, %v1218_v18, %v1221_v55  ;;  %2981 = vcosq.f32 %v975_v56 }
 0x1aa   : > { %v1238_v44 = vsel %vm1230_vm10, %v1221_v55, %v1237_v43  ;;  %v1241_v59 = vsel %vm1231_vm11, %v1227_v38, 1326507024  ;;  %v1075_v46 = vsel %vm992_vm15, %v1074_v28, %v1073_v7  ;;  %v1161_v2 = vclz %v2705_v19  ;;  %v2265_v28 = vld [vmem:[%s4274_s3 + $0x70] sm:$0xff]  ;;  %v2250_v19 = vld [vmem:[%s4273_s2 + $0x78] sm:$0xff] }
 0x1ab   : > { %v1239_v55 = vsel %vm1229_vm9, %v1236_v58, %v1238_v44  ;;  %2983 = vsinq.f32 %v975_v56  ;;  %v1242_v18 = vsel %vm1230_vm10, %v1224_v39, %v1241_v59  ;;  %v2248_v56 = vld [vmem:[%s4273_s2 + $0x68] sm:$0xff]  ;;  %v1149_v39 = vadd.s32 %v3767_v1, %v3791_v6  ;;  %v2263_v58 = vld [vmem:[%s4274_s3 + $0x60] sm:$0xff] }
 0x1ac   : > { %v3912_v52 = vmul.u32.u64.low %v3855_v3, %v1239_v55  ;;  %v3913_v4 = vmul.u32.u64.high %v3855_v3, %v1239_v55, %v3912_v52  ;;  %v2706_v7 = vadd.s32 4294967294, %v1161_v2  ;;  %v1235_v25 = vsel %vm1229_vm9, %v1232_v24, %v1234_v10  ;;  %v2247_v44 = vld [vmem:[%s4273_s2 + $0x60] sm:$0xff] }
 0x1ad   : > { %v1243_v38 = vsel %vm1229_vm9, %v1240_v41, %v1242_v18  ;;  %v1078_v1 = vsel %vm3737_vm3, %v3247_v35, %v1075_v46  ;;  %v2828_v24 = vpack.c.bf16 %v2261_v37, %v2259_v30  ;;  %v3947_v48 = vpack.c.bf16 %v2246_v62, %v2244_v40 }
 0x1ae   : > { %v3944_v6 = vmul.u32.u64.low %v3855_v3, %v1243_v38  ;;  %v3945_v53 = vmul.u32.u64.high %v3855_v3, %v1243_v38, %v3944_v6  ;;  %vm2707_vm12 = vcmp.lt.s32.totalorder %v2706_v7, 0  ;;  %v3949_v43 = vpack.c.bf16 %v2245_v9, %v2243_v60 }
 0x1af   : > { %v2830_v10 = vpack.c.bf16 %v2266_v5, %v2264_v12  ;;  %vm464_vm13 = vweird.f32 %v3186_v11  ;;  %v1164_v41 = vsel %vm2707_vm12, 0, %v2706_v7  ;;  %v1254_v59 = vadd.s32 1, %v3913_v4  ;;  %2829 = vmatpush1.bf16.msra.mxu1 %v2828_v24  ;;  %2843 = vmatprep.subr.bf16.mxu0 %v3947_v48 }
 0x1b0   : > { %v2832_v30 = vpack.c.bf16 %v2265_v28, %v2263_v58  ;;  %v3959_v37 = vpack.c.bf16 %v2250_v19, %v2248_v56  ;;  %2985 = vcosq.f32 %v1078_v1  ;;  %v1165_v40 = vsub.s32 32, %v1164_v41  ;;  %2845 = vmatpush1.bf16.msra.mxu0 %v3949_v43 }
 0x1b1   : > { %v1169_v46 = vsub.s32 4294967266, %v1164_v41  ;;  %v1251_v2 = vmul.u32 %v3855_v3, %v1235_v25  ;;  %2831 = vmatprep.subr.bf16.mxu1 %v2830_v10  ;;  %v1166_v55 = vshll.u32 %v3873_v31, %v1164_v41  ;;  %vm1253_vm14 = vc.u32 %v3945_v53, %v3912_v52 }
 0x1b2   : > { %v3967_v62 = vpack.c.bf16 %v2249_v63, %v2247_v44  ;;  %vm466_vm15 = vcmp.lt.s32.totalorder %v3426_v23, 2  ;;  %v1167_v60 = vshrl.u32 %v1149_v39, %v1165_v40  ;;  %v1255_v18 = vsel %vm1253_vm14, %v1254_v59, %v3913_v4  ;;  %2847 = vmatprep.subr.bf16.mxu0 %v3959_v37 }
 0x1b3   : > { %v1170_v9 = vadd.s32 127, %v1169_v46  ;;  %v468_v3 = vxor.u32 2147483648, %v3470_v27  ;;  %v1256_v12 = vadd.s32 %v1255_v18, %v1251_v2  ;;  %2833 = vmatpush1.bf16.msra.mxu1 %v2832_v30  ;;  %vm467_vm0 = vcmp.eq.s32.totalorder %v3426_v23, 0  ;;  %v3976_v56 = vpop.eup %2981 }
 0x1b4   : > { %v471_v31 = vxor.u32 2147483648, %v3462_v32  ;;  %v1392_v5 = vadd.s32 3, %v3368_v20  ;;  %v1168_v7 = vor.u32 %v1167_v60, %v1166_v55  ;;  %2850 = vmatprep.subr.bf16.mxu1 %v3802_v29  ;;  %vm470_vm1 = vcmp.eq.s32.totalorder %v3426_v23, 2  ;;  %2849 = vmatpush1.bf16.msra.mxu0 %v3967_v62 }
 0x1b5   : > { %v1171_v25 = vshll.u32 %v1170_v9, 23  ;;  %v469_v4 = vsel %vm467_vm0, %v3462_v32, %v468_v3  ;;  %v3981_v39 = vpop.eup %2983  ;;  %vm1095_vm2 = vcmp.lt.s32.totalorder %v3263_v54, 0  ;;  %v1257_v38 = vadd.s32 536870912, %v1256_v12 }
 0x1b6   : > { %v472_v58 = vsel %vm470_vm1, %v471_v31, %v3470_v27  ;;  %v1393_v20 = vand.u32 3, %v1392_v5  ;;  %vm2267_vm3 = vcmask 523264   ;;  %2987 = vsinq.f32 %v1078_v1 }
 0x1b7   : > { %v4315_v28 = vand.u32 2147483647, %v3263_v54  ;;  %v1172_v19 = vor.u32 4788187, %v1171_v25  ;;  %v1179_v6 = vsub.s32 4, %v3858_v42  ;;  %v473_v24 = vsel %vm466_vm15, %v469_v4, %v472_v58 }
 0x1b8   : > { %v1175_v10 = vcvt.s32.f32 %v1168_v7  ;;  %v3995_v44 = vshrl.u32 %v1257_v38, 30  ;;  %v474_v63 = vsel %vm464_vm13, nan, %v473_v24  ;;  %vm1395_vm5 = vcmp.eq.s32.totalorder %v1393_v20, 0 }
 0x1b9   : > { %vm3988_vm4 = vcmp.le.f32.partialorder %v4315_v28, 0.7853982  ;;  %v1173_v1 = vand.u32 2147483647, %v1172_v19  ;;  %v1397_v41 = vsel %vm1395_vm5, %v3462_v32, %v468_v3  ;;  %vm1398_vm7 = vcmp.eq.s32.totalorder %v1393_v20, 2  ;;  %2757 = vmatmul.mubr.msk.f32.vlgmr.msra.gmra.mrb[18].mxu0 %vm2267_vm3, %v474_v63 }
 0x1ba   : > { %v571_v59 = vxor.u32 2147483648, %v3546_v21  ;;  %v1259_v30 = vshll.u32 %v3995_v44, 30  ;;  %vm1394_vm8 = vcmp.lt.s32.totalorder %v1393_v20, 2  ;;  %v1400_v23 = vsel %vm1398_vm7, %v471_v31, %v3470_v27  ;;  %v4006_v2 = vpop.eup %2985 }
 0x1bb   : > { %v4318_v40 = vmov 0.0   ;;  %v1496_v46 = vadd.s32 3, %v3511_v15  ;;  %v1176_v55 = vmul.f32 %v1175_v10, %v1173_v1  ;;  %v1401_v60 = vsel %vm1394_vm8, %v1397_v41, %v1400_v23 }
 0x1bc   : > { %2511 = vmatprep.mubr.f32.mxu0 %v4318_v40  ;;  %v574_v32 = vxor.u32 2147483648, %v3506_v34  ;;  %v568_v9 = vand.u32 3, %v3511_v15  ;;  %v4012_v18 = vadd.s32 %v3912_v52, %v3945_v53  ;;  %v4014_v3 = vsub.s32 %v1256_v12, %v1259_v30 }
 0x1bd   : > { %v1402_v27 = vsel %vm464_vm13, nan, %v1401_v60  ;;  %v1497_v31 = vand.u32 3, %v1496_v46  ;;  %v1177_v5 = vxor.u32 2147483648, %v1176_v55  ;;  %v1282_v7 = vsub.s32 4, %v3995_v44 }
 0x1be   : > { %2748 = vmatmul.mubr.msk.f32.vlgmr.msra.gmra.mrb[0].mxu1 %vm2267_vm3, %v1402_v27  ;;  %vm567_vm6 = vweird.f32 %v3192_v17  ;;  %vm570_vm9 = vcmp.eq.s32.totalorder %v568_v9, 0  ;;  %v1262_v15 = vsub.s32 0, %v4014_v3  ;;  %vm573_vm13 = vcmp.eq.s32.totalorder %v568_v9, 2 }
 0x1bf   : > { %2854 = vmatpush1.bf16.msra.mxu1 %v3805_v51  ;;  %2365 = vmatprep.mubr.f32.mxu1 %v4318_v40  ;;  %vm1498_vm10 = vcmp.lt.s32.totalorder %v1497_v31, 2  ;;  %vm1499_vm11 = vcmp.eq.s32.totalorder %v1497_v31, 0  ;;  %vm1502_vm12 = vcmp.eq.s32.totalorder %v1497_v31, 2  ;;  %v1178_v11 = vsel %vm1095_vm2, %v1177_v5, %v1176_v55 }
 0x1c0   : > { %v1501_v52 = vsel %vm1499_vm11, %v3506_v34, %v571_v59  ;;  %v1504_v53 = vsel %vm1502_vm12, %v574_v32, %v3546_v21  ;;  %v572_v12 = vsel %vm570_vm9, %v3506_v34, %v571_v59  ;;  %2851 = vmatprep.subr.bf16.mxu1 %v3846_v49  ;;  %v1181_v51 = vsel %vm3988_vm4, %v3263_v54, %v1178_v11  ;;  %v4034_v38 = vpop.eup %2987 }
 0x1c1   : > { %v2709_v25 = vmin.u32 %v1262_v15, %v4014_v3  ;;  %v1505_v4 = vsel %vm1498_vm10, %v1501_v52, %v1504_v53  ;;  %vm569_vm14 = vcmp.lt.s32.totalorder %v568_v9, 2  ;;  %v575_v20 = vsel %vm573_vm13, %v574_v32, %v3546_v21 }
 0x1c2   : > { %v1506_v58 = vsel %vm567_vm6, nan, %v1505_v4  ;;  %vm670_vm15 = vweird.f32 %v3200_v26  ;;  %v576_v49 = vsel %vm569_vm14, %v572_v12, %v575_v20  ;;  %v674_v28 = vxor.u32 2147483648, %v3572_v47 }
 0x1c3   : > { %v1264_v34 = vclz %v2709_v25  ;;  %2749 = vmatmul.mubr.msk.f32.gmra.mrb[2].mxu1 %vm2267_vm3, %v1506_v58  ;;  %v677_v19 = vxor.u32 2147483648, %v3567_v33  ;;  %2989 = vcosq.f32 %v1181_v51  ;;  %v577_v24 = vsel %vm567_vm6, nan, %v576_v49 }
 0x1c4   : > { %2371 = vmatprep.mubr.f32.mxu1 %v4318_v40  ;;  %v1600_v10 = vadd.s32 3, %v3516_v16  ;;  %v671_v21 = vand.u32 3, %v3516_v16  ;;  %2855 = vmatpush1.bf16.msra.mxu1 %v3848_v61  ;;  %2991 = vsinq.f32 %v1181_v51  ;;  %v777_v1 = vxor.u32 2147483648, %v3726_v50 }
 0x1c5   : > { %v2710_v63 = vadd.s32 4294967294, %v1264_v34  ;;  %2758 = vmatmul.mubr.msk.f32.gmra.mrb[20].mxu0 %vm2267_vm3, %v577_v24  ;;  %v1704_v41 = vadd.s32 3, %v3534_v13  ;;  %2852 = vmatprep.subr.bf16.mxu1 %v3947_v48  ;;  %v780_v59 = vxor.u32 2147483648, %v3718_v22  ;;  %vm1198_vm13 = vcmp.lt.s32.totalorder %v3276_v8, 0 }
 0x1c6   : > { %2517 = vmatprep.mubr.f32.mxu0 %v4318_v40  ;;  %v1601_v17 = vand.u32 3, %v1600_v10  ;;  %vm673_vm0 = vcmp.eq.s32.totalorder %v671_v21, 0  ;;  %vm676_vm1 = vcmp.eq.s32.totalorder %v671_v21, 2  ;;  %vm672_vm6 = vcmp.lt.s32.totalorder %v671_v21, 2 }
 0x1c7   : > { %vm2711_vm5 = vcmp.lt.s32.totalorder %v2710_v63, 0  ;;  %v675_v16 = vsel %vm673_vm0, %v3567_v33, %v674_v28  ;;  %v678_v61 = vsel %vm676_vm1, %v677_v19, %v3572_v47  ;;  %v1705_v30 = vand.u32 3, %v1704_v41 }
 0x1c8   : > { %v1267_v23 = vsel %vm2711_vm5, 0, %v2710_v63  ;;  %vm1602_vm7 = vcmp.lt.s32.totalorder %v1601_v17, 2  ;;  %vm1603_vm8 = vcmp.eq.s32.totalorder %v1601_v17, 0  ;;  %2856 = vmatpush1.bf16.msra.mxu1 %v3949_v43  ;;  %vm1606_vm9 = vcmp.eq.s32.totalorder %v1601_v17, 2 }
 0x1c9   : > { %v1268_v48 = vsub.s32 32, %v1267_v23  ;;  %v1272_v46 = vsub.s32 4294967266, %v1267_v23  ;;  %v1605_v55 = vsel %vm1603_vm8, %v3567_v33, %v674_v28  ;;  %2853 = vmatprep.subr.bf16.mxu1 %v3959_v37  ;;  %v1269_v60 = vshll.u32 %v4014_v3, %v1267_v23 }
 0x1ca   : > { %v1608_v32 = vsel %vm1606_vm9, %v677_v19, %v3572_v47  ;;  %v679_v9 = vsel %vm672_vm6, %v675_v16, %v678_v61  ;;  %vm1707_vm10 = vcmp.eq.s32.totalorder %v1705_v30, 0  ;;  %vm1710_vm11 = vcmp.eq.s32.totalorder %v1705_v30, 2 }
 0x1cb   : > { %v1270_v27 = vshrl.u32 %v4012_v18, %v1268_v48  ;;  %v1273_v31 = vadd.s32 127, %v1272_v46  ;;  %v1609_v5 = vsel %vm1602_vm7, %v1605_v55, %v1608_v32  ;;  %v680_v43 = vsel %vm670_vm15, nan, %v679_v9 }
 0x1cc   : > { %v1610_v15 = vsel %vm670_vm15, nan, %v1609_v5  ;;  %2759 = vmatmul.mubr.msk.f32.gmra.mrb[22].mxu0 %vm2267_vm3, %v680_v43  ;;  %v1709_v33 = vsel %vm1707_vm10, %v3718_v22, %v777_v1  ;;  %v774_v37 = vand.u32 3, %v3534_v13  ;;  %2857 = vmatpush1.bf16.msra.mxu1 %v3967_v62  ;;  %vm1706_vm12 = vcmp.lt.s32.totalorder %v1705_v30, 2 }
 0x1cd   : > { %v1271_v47 = vor.u32 %v1270_v27, %v1269_v60  ;;  %v1274_v3 = vshll.u32 %v1273_v31, 23  ;;  %2750 = vmatmul.mubr.msk.f32.gmra.mrb[4].mxu1 %vm2267_vm3, %v1610_v15  ;;  %2523 = vmatprep.mubr.f32.mxu0 %v4318_v40  ;;  %v1712_v18 = vsel %vm1710_vm11, %v780_v59, %v3726_v50  ;;  %v4074_v26 = vpop.eup %2989  ;;  %vm773_vm14 = vweird.f32 %v3206_v36  ;;  %v4324_v15 = vld [vmem:[#allocation7_spill] sm:$0xff] }
 0x1ce   : > { %2377 = vmatprep.mubr.f32.mxu1 %v4318_v40  ;;  %v1713_v13 = vsel %vm1706_vm12, %v1709_v33, %v1712_v18  ;;  %vm775_vm15 = vcmp.lt.s32.totalorder %v774_v37, 2  ;;  %vm776_vm0 = vcmp.eq.s32.totalorder %v774_v37, 0  ;;  %v4079_v62 = vpop.eup %2991  ;;  %v4319_v11 = vand.u32 2147483647, %v3276_v8 }
 0x1cf   : > { %v1275_v53 = vor.u32 4788187, %v1274_v3  ;;  %v1714_v12 = vsel %vm773_vm14, nan, %v1713_v13  ;;  %v778_v51 = vsel %vm776_vm0, %v3718_v22, %v777_v1  ;;  %vm779_vm5 = vcmp.eq.s32.totalorder %v774_v37, 2 }
 0x1d0   : > { %vm4083_vm1 = vcmp.le.f32.partialorder %v4319_v11, 0.7853982  ;;  %v1278_v25 = vcvt.s32.f32 %v1271_v47  ;;  %v781_v4 = vsel %vm779_vm5, %v780_v59, %v3726_v50  ;;  %v880_v58 = vxor.u32 2147483648, %v3862_v14  ;;  %v4322_v59 = vld [vmem:[#allocation6_spill] sm:$0xff] }
 0x1d1   : > { %v1808_v20 = vadd.s32 3, %v3665_v0  ;;  %v1276_v34 = vand.u32 2147483647, %v1275_v53  ;;  %2751 = vmatmul.mubr.msk.f32.gmra.mrb[6].mxu1 %vm2267_vm3, %v1714_v12  ;;  %v782_v49 = vsel %vm775_vm15, %v778_v51, %v781_v4  ;;  %v883_v28 = vxor.u32 2147483648, %v3731_v45 }
 0x1d2   : > { %v877_v19 = vand.u32 3, %v3665_v0  ;;  %v783_v24 = vsel %vm773_vm14, nan, %v782_v49  ;;  %2383 = vmatprep.mubr.f32.mxu1 %v4318_v40  ;;  %vm876_vm7 = vweird.f32 %v3219_v57  ;;  %v983_v22 = vxor.u32 2147483648, %v3981_v39 }
 0x1d3   : > { %v1809_v50 = vand.u32 3, %v1808_v20  ;;  %v1279_v10 = vmul.f32 %v1278_v25, %v1276_v34  ;;  %2760 = vmatmul.mubr.msk.f32.gmra.mrb[24].mxu0 %vm2267_vm3, %v783_v24  ;;  %v1912_v16 = vadd.s32 3, %v4322_v59  ;;  %v980_v61 = vand.u32 3, %v4322_v59 }
 0x1d4   : > { %vm878_vm8 = vcmp.lt.s32.totalorder %v877_v19, 2  ;;  %vm879_vm6 = vcmp.eq.s32.totalorder %v877_v19, 0  ;;  %vm882_vm9 = vcmp.eq.s32.totalorder %v877_v19, 2  ;;  %2529 = vmatprep.mubr.f32.mxu0 %v4318_v40  ;;  %v1283_v57 = vsel %vm1198_vm13, %v1282_v7, %v3995_v44  ;;  %v4323_v7 = vld [vmem:[#allocation5_spill] sm:$0xff] }
 0x1d5   : > { %vm1810_vm10 = vcmp.lt.s32.totalorder %v1809_v50, 2  ;;  %vm1811_vm11 = vcmp.eq.s32.totalorder %v1809_v50, 0  ;;  %vm1814_vm12 = vcmp.eq.s32.totalorder %v1809_v50, 2  ;;  %v881_v36 = vsel %vm879_vm6, %v3731_v45, %v880_v58 }
 0x1d6   : > { %v1280_v0 = vxor.u32 2147483648, %v1279_v10  ;;  %v1813_v21 = vsel %vm1811_vm11, %v3731_v45, %v880_v58  ;;  %v1816_v63 = vsel %vm1814_vm12, %v883_v28, %v3862_v14  ;;  %v884_v1 = vsel %vm882_vm9, %v883_v28, %v3862_v14 }
 0x1d7   : > { %v1817_v41 = vsel %vm1810_vm10, %v1813_v21, %v1816_v63  ;;  %v885_v17 = vsel %vm878_vm8, %v881_v36, %v884_v1  ;;  %v986_v45 = vxor.u32 2147483648, %v3976_v56  ;;  %v1180_v14 = vsel %vm1095_vm2, %v1179_v6, %v3858_v42 }
 0x1d8   : > { %v1281_v30 = vsel %vm1198_vm13, %v1280_v0, %v1279_v10  ;;  %v1818_v23 = vsel %vm876_vm7, nan, %v1817_v41  ;;  %v886_v48 = vsel %vm876_vm7, nan, %v885_v17  ;;  %v1913_v55 = vand.u32 3, %v1912_v16 }
 0x1d9   : > { %v1284_v46 = vsel %vm4083_vm1, %v3276_v8, %v1281_v30  ;;  %2752 = vmatmul.mubr.msk.f32.gmra.mrb[8].mxu1 %vm2267_vm3, %v1818_v23  ;;  %2761 = vmatmul.mubr.msk.f32.gmra.mrb[26].mxu0 %vm2267_vm3, %v886_v48  ;;  %vm982_vm14 = vcmp.eq.s32.totalorder %v980_v61, 0  ;;  %vm981_vm2 = vcmp.lt.s32.totalorder %v980_v61, 2  ;;  %vm985_vm5 = vcmp.eq.s32.totalorder %v980_v61, 2 }
 0x1da   : > { %2993 = vcosq.f32 %v1284_v46  ;;  %2389 = vmatprep.mubr.f32.mxu1 %v4318_v40  ;;  %2535 = vmatprep.mubr.f32.mxu0 %v4318_v40  ;;  %v984_v42 = vsel %vm982_vm14, %v3976_v56, %v983_v22  ;;  %vm1915_vm15 = vcmp.eq.s32.totalorder %v1913_v55, 0  ;;  %vm1918_vm0 = vcmp.eq.s32.totalorder %v1913_v55, 2 }
 0x1db   : > { %2995 = vsinq.f32 %v1284_v46  ;;  %vm1914_vm7 = vcmp.lt.s32.totalorder %v1913_v55, 2  ;;  %v1917_v6 = vsel %vm1915_vm15, %v3976_v56, %v983_v22  ;;  %v1920_v60 = vsel %vm1918_vm0, %v986_v45, %v3981_v39 }
 0x1dc   : > { %v987_v32 = vsel %vm985_vm5, %v986_v45, %v3981_v39  ;;  %v1182_v44 = vsel %vm3988_vm4, 0, %v1180_v14  ;;  %vm979_vm13 = vweird.f32 %v4323_v7  ;;  %v1921_v9 = vsel %vm1914_vm7, %v1917_v6, %v1920_v60 }
 0x1dd   : > { %v988_v27 = vsel %vm981_vm2, %v984_v42, %v987_v32  ;;  %v1285_v31 = vsel %vm4083_vm1, 0, %v1283_v57  ;;  %v1922_v5 = vsel %vm979_vm13, nan, %v1921_v9  ;;  %v2016_v33 = vadd.s32 3, %v4324_v15 }
 0x1de   : > { %v989_v43 = vsel %vm979_vm13, nan, %v988_v27  ;;  %2753 = vmatmul.mubr.msk.f32.gmra.mrb[10].mxu1 %vm2267_vm3, %v1922_v5  ;;  %v1086_v56 = vxor.u32 2147483648, %v4034_v38  ;;  %v1089_v39 = vxor.u32 2147483648, %v4006_v2  ;;  %v2120_v37 = vadd.s32 3, %v1182_v44 }
 0x1df   : > { %2762 = vmatmul.mubr.msk.f32.gmra.mrb[28].mxu0 %vm2267_vm3, %v989_v43  ;;  %2395 = vmatprep.mubr.f32.mxu1 %v4318_v40  ;;  %v2017_v29 = vand.u32 3, %v2016_v33  ;;  %v1189_v47 = vxor.u32 2147483648, %v4079_v62  ;;  %v2224_v3 = vadd.s32 3, %v1285_v31  ;;  %v1192_v18 = vxor.u32 2147483648, %v4074_v26 }
 0x1e0   : > { %v2121_v52 = vand.u32 3, %v2120_v37  ;;  %v1083_v51 = vand.u32 3, %v4324_v15  ;;  %vm1082_vm6 = vweird.f32 %v3247_v35  ;;  %vm1185_vm12 = vweird.f32 %v3263_v54 }
 0x1e1   : > { %vm2018_vm4 = vcmp.lt.s32.totalorder %v2017_v29, 2  ;;  %vm2019_vm1 = vcmp.eq.s32.totalorder %v2017_v29, 0  ;;  %vm2022_vm8 = vcmp.eq.s32.totalorder %v2017_v29, 2  ;;  %v2225_v53 = vand.u32 3, %v2224_v3 }
 0x1e2   : > { %v2021_v13 = vsel %vm2019_vm1, %v4006_v2, %v1086_v56  ;;  %v2024_v11 = vsel %vm2022_vm8, %v1089_v39, %v4034_v38  ;;  %vm2122_vm9 = vcmp.lt.s32.totalorder %v2121_v52, 2  ;;  %vm2123_vm10 = vcmp.eq.s32.totalorder %v2121_v52, 0 }
 0x1e3   : > { %v2025_v25 = vsel %vm2018_vm4, %v2021_v13, %v2024_v11  ;;  %vm2126_vm11 = vcmp.eq.s32.totalorder %v2121_v52, 2  ;;  %v2125_v20 = vsel %vm2123_vm10, %v4074_v26, %v1189_v47  ;;  %vm2227_vm14 = vcmp.eq.s32.totalorder %v2225_v53, 0 }
 0x1e4   : > { %v2994_v12 = vpop.eup %2993  ;;  %v2026_v58 = vsel %vm1082_vm6, nan, %v2025_v25  ;;  %v2128_v34 = vsel %vm2126_vm11, %v1192_v18, %v4079_v62  ;;  %vm2230_vm2 = vcmp.eq.s32.totalorder %v2225_v53, 2  ;;  %vm2226_vm15 = vcmp.lt.s32.totalorder %v2225_v53, 2 }
 0x1e5   : > { %v2996_v4 = vpop.eup %2995  ;;  %2754 = vmatmul.mubr.msk.f32.gmra.mrb[12].mxu1 %vm2267_vm3, %v2026_v58  ;;  %v1295_v28 = vxor.u32 2147483648, %v2994_v12  ;;  %v2129_v19 = vsel %vm2122_vm9, %v2125_v20, %v2128_v34  ;;  %vm1085_vm0 = vcmp.eq.s32.totalorder %v1083_v51, 0  ;;  %vm1088_vm5 = vcmp.eq.s32.totalorder %v1083_v51, 2 }
 0x1e6   : > { %v1292_v49 = vxor.u32 2147483648, %v2996_v4  ;;  %2401 = vmatprep.mubr.f32.mxu1 %v4318_v40  ;;  %v2130_v24 = vsel %vm1185_vm12, nan, %v2129_v19  ;;  %vm1288_vm7 = vweird.f32 %v3276_v8  ;;  %v1186_v36 = vand.u32 3, %v1182_v44 }
 0x1e7   : > { %v2232_v22 = vsel %vm2230_vm2, %v1295_v28, %v2996_v4  ;;  %v1087_v0 = vsel %vm1085_vm0, %v4006_v2, %v1086_v56  ;;  %v1090_v21 = vsel %vm1088_vm5, %v1089_v39, %v4034_v38  ;;  %vm1084_vm13 = vcmp.lt.s32.totalorder %v1083_v51, 2 }
 0x1e8   : > { %v2229_v50 = vsel %vm2227_vm14, %v2994_v12, %v1292_v49  ;;  %v1091_v1 = vsel %vm1084_vm13, %v1087_v0, %v1090_v21  ;;  %vm1188_vm4 = vcmp.eq.s32.totalorder %v1186_v36, 0  ;;  %vm1191_vm1 = vcmp.eq.s32.totalorder %v1186_v36, 2 }
 0x1e9   : > { %v2233_v10 = vsel %vm2226_vm15, %v2229_v50, %v2232_v22  ;;  %2755 = vmatmul.mubr.msk.f32.gmra.mrb[14].mxu1 %vm2267_vm3, %v2130_v24  ;;  %v1289_v41 = vand.u32 3, %v1285_v31  ;;  %v1190_v17 = vsel %vm1188_vm4, %v4074_v26, %v1189_v47  ;;  %v1193_v2 = vsel %vm1191_vm1, %v1192_v18, %v4079_v62 }
 0x1ea   : > { %2407 = vmatprep.mubr.f32.mxu1 %v4318_v40  ;;  %v2234_v63 = vsel %vm1288_vm7, nan, %v2233_v10  ;;  %v1092_v38 = vsel %vm1082_vm6, nan, %v1091_v1  ;;  %vm1187_vm8 = vcmp.lt.s32.totalorder %v1186_v36, 2 }
 0x1eb   : > { %v1194_v59 = vsel %vm1187_vm8, %v1190_v17, %v1193_v2  ;;  %vm1291_vm9 = vcmp.eq.s32.totalorder %v1289_v41, 0  ;;  %vm1294_vm10 = vcmp.eq.s32.totalorder %v1289_v41, 2  ;;  %vm1290_vm11 = vcmp.lt.s32.totalorder %v1289_v41, 2 }
 0x1ec   : > { %v1293_v16 = vsel %vm1291_vm9, %v2994_v12, %v1292_v49  ;;  %v1296_v61 = vsel %vm1294_vm10, %v1295_v28, %v2996_v4  ;;  %v1195_v26 = vsel %vm1185_vm12, nan, %v1194_v59 }
 0x1ed   : > { %2756 = vmatmul.mubr.msk.f32.gmra.mrb[16].mxu1 %vm2267_vm3, %v2234_v63  ;;  %v1297_v35 = vsel %vm1290_vm11, %v1293_v16, %v1296_v61 }
 0x1ee   : > { %2541 = vmatprep.mubr.f32.mxu1 %v4318_v40  ;;  %v1298_v62 = vsel %vm1288_vm7, nan, %v1297_v35 }
 0x1f1   : > { %2763 = vmatmul.mubr.msk.f32.vlgmr.msra.gmra.mrb[12].mxu1 %vm2267_vm3, %v1092_v38 }
 0x1f2   : > { %2547 = vmatprep.mubr.f32.mxu1 %v4318_v40 }
 0x1f5   : > { %2764 = vmatmul.mubr.msk.f32.gmra.mrb[14].mxu1 %vm2267_vm3, %v1195_v26 }
 0x1f6   : > { %2553 = vmatprep.mubr.f32.mxu1 %v4318_v40 }
 0x1f9   : > { %2765 = vmatmul.mubr.msk.f32.gmra.mrb[16].mxu1 %vm2267_vm3, %v1298_v62 }
 0x28c   : > { %v2507_v30 = vpop.f32.mrb[18].mxu0 }
 0x28d   : > { %v2509_v23 = vpop.f32.mrb[19].mxu0 }
 0x291   : > { %v2361_v48 = vpop.f32.mrb[0].mxu1 }
 0x292   : > { %v2508_v45 = vadd.f32 %v2507_v30, %v2361_v48  ;;  %v2363_v54 = vpop.f32.mrb[1].mxu1 }
 0x293   : > { %v2510_v14 = vadd.f32 %v2509_v23, %v2363_v54 }
 0x294   : > { %2560 = vst [vmem:[%s4188_s11] sm:$0xff] %v2508_v45 }
 0x295   : > { %2561 = vst [vmem:[%s4188_s11 + $0x8] sm:$0xff] %v2510_v14 }
 0x296   : > { %v2367_v8 = vpop.f32.mrb[2].mxu1 }
 0x297   : > { %v2369_v40 = vpop.f32.mrb[3].mxu1 }
 0x298   : > { %v2513_v46 = vpop.f32.mrb[20].mxu0 }
 0x299   : > { %v2514_v55 = vadd.f32 %v2513_v46, %v2367_v8  ;;  %v2515_v57 = vpop.f32.mrb[21].mxu0 }
 0x29a   : > { %v2516_v42 = vadd.f32 %v2515_v57, %v2369_v40 }
 0x29b   : > { %2562 = vst [vmem:[%s4188_s11 + $0x10] sm:$0xff] %v2514_v55 }
 0x29c   : > { %2563 = vst [vmem:[%s4188_s11 + $0x18] sm:$0xff] %v2516_v42 }
 0x29f   : > { %v2519_v6 = vpop.f32.mrb[22].mxu0 }
 0x2a0   : > { %v2373_v60 = vpop.f32.mrb[4].mxu1  ;;  %v2521_v32 = vpop.f32.mrb[23].mxu0 }
 0x2a1   : > { %v2520_v44 = vadd.f32 %v2519_v6, %v2373_v60  ;;  %v2375_v7 = vpop.f32.mrb[5].mxu1 }
 0x2a2   : > { %v2522_v9 = vadd.f32 %v2521_v32, %v2375_v7 }
 0x2a3   : > { %2564 = vst [vmem:[%s4188_s11 + $0x20] sm:$0xff] %v2520_v44 }
 0x2a4   : > { %2565 = vst [vmem:[%s4188_s11 + $0x28] sm:$0xff] %v2522_v9  ;;  %v2379_v27 = vpop.f32.mrb[6].mxu1 }
 0x2a5   : > { %v2381_v31 = vpop.f32.mrb[7].mxu1 }
 0x2a6   : > { %v2525_v5 = vpop.f32.mrb[24].mxu0 }
 0x2a7   : > { %v2526_v43 = vadd.f32 %v2525_v5, %v2379_v27  ;;  %v2527_v15 = vpop.f32.mrb[25].mxu0 }
 0x2a8   : > { %v2528_v33 = vadd.f32 %v2527_v15, %v2381_v31 }
 0x2a9   : > { %2566 = vst [vmem:[%s4188_s11 + $0x30] sm:$0xff] %v2526_v43 }
 0x2aa   : > { %2567 = vst [vmem:[%s4188_s11 + $0x38] sm:$0xff] %v2528_v33 }
 0x2ac   : > { %v2385_v56 = vpop.f32.mrb[8].mxu1  ;;  %v2531_v39 = vpop.f32.mrb[26].mxu0 }
 0x2ad   : > { %v2532_v29 = vadd.f32 %v2531_v39, %v2385_v56  ;;  %v2387_v37 = vpop.f32.mrb[9].mxu1  ;;  %v2533_v47 = vpop.f32.mrb[27].mxu0 }
 0x2ae   : > { %v2534_v3 = vadd.f32 %v2533_v47, %v2387_v37 }
 0x2af   : > { %2568 = vst [vmem:[%s4188_s11 + $0x40] sm:$0xff] %v2532_v29 }
 0x2b0   : > { %2569 = vst [vmem:[%s4188_s11 + $0x48] sm:$0xff] %v2534_v3 }
 0x2b1   : > { %v2391_v18 = vpop.f32.mrb[10].mxu1 }
 0x2b2   : > { %v2537_v13 = vpop.f32.mrb[28].mxu0  ;;  %v2393_v52 = vpop.f32.mrb[11].mxu1 }
 0x2b3   : > { %v2538_v11 = vadd.f32 %v2537_v13, %v2391_v18  ;;  %v2539_v53 = vpop.f32.mrb[29].mxu0 }
 0x2b4   : > { %v2540_v12 = vadd.f32 %v2539_v53, %v2393_v52 }
 0x2b5   : > { %2570 = vst [vmem:[%s4188_s11 + $0x50] sm:$0xff] %v2538_v11 }
 0x2b6   : > { %2571 = vst [vmem:[%s4188_s11 + $0x58] sm:$0xff] %v2540_v12 }
 0x2c4   : > { %v2543_v51 = vpop.f32.mrb[12].mxu1 }
 0x2c5   : > { %2572 = vst [vmem:[%s4188_s11 + $0x60] sm:$0xff] %v2543_v51  ;;  %v2545_v25 = vpop.f32.mrb[13].mxu1 }
 0x2c6   : > { %2573 = vst [vmem:[%s4188_s11 + $0x68] sm:$0xff] %v2545_v25 }
 0x2c8   : > { %v2549_v4 = vpop.f32.mrb[14].mxu1  ;;  %2585 = sbr.rel (!%p3135_p5) target bundleno = 747 (0x2eb), region = 40 }
 0x2c9   : > { %2574 = vst [vmem:[%s4188_s11 + $0x70] sm:$0xff] %v2549_v4  ;;  %v2551_v58 = vpop.f32.mrb[15].mxu1 }
 0x2ca   : > { %2575 = vst [vmem:[%s4188_s11 + $0x78] sm:$0xff] %v2551_v58 }
 0x2cc   : > { %v2555_v20 = vpop.f32.mrb[16].mxu1 }
 0x2cd   : > { %2576 = vst [vmem:[%s4188_s11 + $0x80] sm:$0xff] %v2555_v20  ;;  %v2557_v34 = vpop.f32.mrb[17].mxu1 }
 0x2ce   : > { %2577 = vst [vmem:[%s4188_s11 + $0x88] sm:$0xff] %v2557_v34 }
 0x2cf   : > { %s4330_s13 = smov (!%p2588_p11, %s2587_s13), 9 }
 0x2d0   : > { %s4215_s14 = sshll.u32 %s4330_s13, 8 }
 0x2d1   : > { %s2593_s20 = ssub.s32 2304, %s4215_s14 }
 0x2d2   : > { %2594 = vsyncadd %s4210_s12, %s2593_s20  ;;  %p2768_p12 = scmp.ne.s32.totalorder %s4215_s14, 0  ;;  %s2778_s22 = smul.u32 2304, %s3118_s19 }
 0x2d3   : > { %s2600_s23 = sshll.u32 %s4188_s11, 4  ;;  %s3069_s30 = smov [#allocation2]   ;;  %s4227_s23 = int_to_ptr.vmem [resolvable:$true] %s2600_s23 }
 0x2d4   : > { %s4225_s28 = scalar_lea.hbm %s4275_s4, %s2778_s22  ;;  %s2997_s29 = scalar_lea.vmem %s4227_s23, %s4215_s14 }
 0x2d5   : > { %p2998_p13 = scmp.ne.s32.totalorder %s4227_s23, %s2997_s29  ;;  %s3001_s5 = sshll.u32 %s3069_s30, 4  ;;  %s3002_s5 = int_to_ptr.vmem [resolvable:$false] %s3001_s5 }
 0x2d6   : > { %s3003_s19 = scalar_lea.vmem %s3002_s5, 4608  ;;  %p3004_p2 = scmp.lt.s32.totalorder %s4227_s23, %s3002_s5 }
 0x2d7   : > { %p2999_p0 = pnand %p2998_p13, %p2768_p12  ;;  %p3005_p3 = scmp.lt.s32.totalorder %s3003_s19, %s2997_s29 }
 0x2d9   : > { %p3000_p1 = pneg %p2999_p0  ;;  %p3006_p4 = por %p3005_p3, %p3004_p2 }
 0x2db   : > { %p3007_p5 = pnand %p3006_p4, %p3000_p1 }
 0x2dd   : > { %3010 = shalt.err (!%p3007_p5)
}
 0x2de   : > { %s3011_s6 = scalar_lea.hbm %s4225_s28, %s4215_s14  ;;  %s3015_s9 = scalar_lea.hbm %s4275_s4, 8448 }
 0x2df   : > { %p3012_p7 = scmp.ne.s32.totalorder %s4225_s28, %s3011_s6  ;;  %p3016_p10 = scmp.lt.u32.totalorder %s4225_s28, %s4275_s4 }
 0x2e0   : > { %p3017_p11 = scmp.lt.u32.totalorder %s3015_s9, %s3011_s6  ;;  %p3019_p0 = scmp.lt.u32.totalorder %s3011_s6, %s4225_s28 }
 0x2e1   : > { %p3013_p8 = pnand %p3012_p7, %p2768_p12 }
 0x2e2   : > { %p3018_p13 = por %p3017_p11, %p3016_p10 }
 0x2e3   : > { %p3014_p9 = pneg %p3013_p8 }
 0x2e4   : > { %p3020_p1 = por %p3019_p0, %p3018_p13 }
 0x2e6   : > { %p3021_p2 = pnand %p3020_p1, %p3014_p9 }
 0x2e8   : > { %3024 = shalt.err (!%p3021_p2)
}
 0x2e9   : > { %s3070_s13 = smov 256   ;;  %s3071_s20 = smov 16  }
 0x2ea   : > { %2606 = dma.vmem_to_hbm [thread:$0]  (%p2768_p12), %s4227_s23, %s4215_s14, %s4225_s28, %s4210_s12, %s3070_s13, %s3070_s13, %s3071_s20  }
 0x2eb PF: > { %p2918_p3 = scmp.ge.s32.totalorder %s3059_s18, 2  ;;  %s2615_s22 = sand.u32 1, %s3047_s15  }
 0x2ec   : > { %s2616_s25 = scalar_lea.sflag [#allocation3], %s2615_s22 }
 0x2ed   : > { %p2915_p4 = pnand %p2918_p3, %p3139_p6 }
 0x2ef   : > { %3042 = dma.done.wait (!%p2915_p4), %s2616_s25, 2304  }
 0x2f0   : > { %3044 = vsyncadd (!%p2915_p4), %s2616_s25, 4294964992  ;;  %p14_p5 = scmp.ge.s32.totalorder %s3122_s21, 6   ;;  %s4325_s15 = smov %s3051_s16 }
 0x2f1   : > { %s4326_s16 = smov %s3055_s17  ;;  %s4327_s17 = smov %s3133_s24 }
 0x2f2   : > { %s4328_s18 = smov %s3122_s21  ;;  %16 = sbr.rel (!%p14_p5) target bundleno = 3 (0x3), region = 71 }
 0x2f9   :  { %2621 = vsyncpa [#allocation3], 1 }
 0x2fa   :  { %2623 = vsyncpa [#allocation3 + $0x1], 1 }

</bundles_post_ra>
